<compile_context>
chip_gen: v5e
topology: v5e:2x2
jax: 0.10.0
libtpu: 0.0.40
codegen_flags: <defaults>
</compile_context>

<pallas_src>
import functools

import numpy as np
import jax
import jax.numpy as jnp
from jax import lax
from jax.experimental import pallas as pl
from jax.experimental.pallas import tpu as pltpu

_LANE = 128


def _round_up(x, m):
    return ((x + m - 1) // m) * m


def _pad_to(x, shape):
    return jnp.pad(x, [(0, s - d) for d, s in zip(x.shape, shape)])


def _vmem_limit_bytes():
    """Generation-aware VMEM limit: ~75% of physical, capped at 100 MiB."""
    try:
        info = pltpu.get_tpu_info()
        cap = int(getattr(info, "vmem_capacity_bytes", 0) or 0)
        if cap > 0:
            return int(min(100 * 1024 * 1024, (cap * 3) // 4))
    except Exception:
        pass
    return 48 * 1024 * 1024          # safe on v7x (64 MiB physical)


def _sage_assign_kernel(adj_ref, h_ref, gid_ref, colgid_ref, rep_ref,
                        ws_ref, wn_ref, b_ref,
                        s_ref, st_ref, feat_ref,
                        acc_nb, *, a_true, f_pad, dp, tm, tn):
    """Pass 1, grid = (row tiles i, col tiles j) of adj.

    Accumulates adj[i,j] @ h_j over j (the ones-column of h carries the
    in-degree); on the last j step computes feat, the softmax assignment and
    the block-diagonal S rows for this row tile (stored as S and S^T).
    """
    i = pl.program_id(0)
    j = pl.program_id(1)
    nj = pl.num_programs(1)

    @pl.when(j == 0)
    def _():
        acc_nb[...] = jnp.zeros_like(acc_nb)

    a_tile = adj_ref[...].astype(jnp.bfloat16)               # int8 0/1 -> bf16, exact
    h_j = h_ref[pl.ds(pl.multiple_of(j * tn, tn), tn), :]    # resident h, bf16
    acc_nb[...] += jnp.dot(a_tile, h_j, preferred_element_type=jnp.float32)

    @pl.when(j == nj - 1)
    def _():
        acc = acc_nb[...]                                    # (tm, Dp) f32
        deg = jnp.maximum(acc[:, dp - 1:dp], 1.0)            # degree from ones-column
        neigh = (acc / deg).astype(jnp.bfloat16)             # zero in-degree -> zeros
        h_i = h_ref[pl.ds(pl.multiple_of(i * tm, tm), tm), :]

        fused = (jnp.dot(h_i, ws_ref[...], preferred_element_type=jnp.float32)
                 + jnp.dot(neigh, wn_ref[...], preferred_element_type=jnp.float32)
                 + b_ref[...])
        fused = jnp.maximum(fused, 0.0)                      # relu on feat and logits
        feat = fused[:, :f_pad]                              # lane-tile aligned splits
        logits = fused[:, f_pad:]

        # Softmax over the true assignment columns only (padded lanes masked).
        col = lax.broadcasted_iota(jnp.int32, logits.shape, 1)
        logits = jnp.where(col < a_true, logits, -1e30)
        m = jnp.max(logits, axis=1, keepdims=True)
        e = jnp.exp(logits - m)
        assign = (e / jnp.sum(e, axis=1, keepdims=True)).astype(jnp.bfloat16)

        # torch.block_diag(*split(assign)) == (assign @ rep) * membership mask,
        # membership mask built in-kernel from per-row / per-column graph ids.
        s = jnp.dot(assign, rep_ref[...], preferred_element_type=jnp.float32)
        member = colgid_ref[...] == gid_ref[...]             # (1,P) vs (tm,1) -> (tm,P)
        s_bf = jnp.where(member, s, 0.0).astype(jnp.bfloat16)

        feat_ref[...] = feat.astype(jnp.bfloat16)
        s_ref[...] = s_bf
        st_ref[...] = s_bf.T                                 # bf16 transpose (XLU)


def _pool_kernel(st_ref, s_ref, adj_ref, feat_ref, adj_new_ref, h_new_ref, *, tn):
    """Pass 2: adj_new = sum_{i,j} S_i^T @ adj[i,j] @ S_j ; h_new = sum_i S_i^T @ feat_i.

    Grid = (core split c, row tiles i, col tiles j); per-core partial sums are
    written to output slab c and reduced by XLA afterwards.
    """
    i = pl.program_id(1)
    j = pl.program_id(2)

    @pl.when(jnp.logical_and(i == 0, j == 0))
    def _():
        adj_new_ref[...] = jnp.zeros_like(adj_new_ref)
        h_new_ref[...] = jnp.zeros_like(h_new_ref)

    st_i = st_ref[...]                                       # (P, tm) bf16
    a_tile = adj_ref[...].astype(jnp.bfloat16)               # int8 -> bf16
    s_j = s_ref[pl.ds(pl.multiple_of(j * tn, tn), tn), :]    # resident S, bf16
    t = jnp.dot(a_tile, s_j, preferred_element_type=jnp.float32)      # (tm, P) f32
    adj_new_ref[0] = adj_new_ref[0] + jnp.dot(
        st_i, t.astype(jnp.bfloat16), preferred_element_type=jnp.float32)

    @pl.when(j == 0)
    def _():
        h_new_ref[0] = h_new_ref[0] + jnp.dot(
            st_i, feat_ref[...], preferred_element_type=jnp.float32)


def diffpool_forward(h, adj, batch_num_nodes, params, *, tile_nodes=512):
    N, D = h.shape
    B = len(batch_num_nodes)
    A = params["W_self_p"].shape[1]
    Fo = params["W_self_f"].shape[1]
    assert tile_nodes % _LANE == 0
    assert all(n > 0 for n in batch_num_nodes)

    tm = tn = tile_nodes
    gi0 = -(-N // tm)
    n_split = 2 if gi0 >= 2 else 1           # megacore split of pass-2 row tiles
    Np = _round_up(N, n_split * tm)
    gi = Np // tm
    gi_pc = gi // n_split
    gj = Np // tn

    Dp = _round_up(D + 1, _LANE)              # +1 guarantees a free lane for degree
    Ap = _round_up(A, _LANE)
    Fp = _round_up(Fo, _LANE)
    P = _round_up(B * A, _LANE)

    # --- glue (pure setup, no heavy compute) -----------------------------------
    graph_id = np.repeat(np.arange(B), np.asarray(batch_num_nodes))        # (N,)
    gid_np = np.full((Np, 1), -1, np.int32)                                # pad -> -1
    gid_np[:N, 0] = graph_id
    colgid_np = np.full((1, P), -2, np.int32)                              # pad -> -2
    colgid_np[0, :B * A] = np.arange(B * A) // A
    # Replication matrix: (assign @ rep)[n, g*A + a] = assign[n, a]  (0/1, exact bf16).
    rep_np = np.zeros((Ap, P), np.float32)
    for g in range(B):
        rep_np[np.arange(A), g * A + np.arange(A)] = 1.0

    gid = jnp.asarray(gid_np)
    colgid = jnp.asarray(colgid_np)
    rep = jnp.asarray(rep_np).astype(jnp.bfloat16)

    # adj stored int8 (0/1 adjacency assumed -> exact); cast to bf16 in-kernel.
    adj_p = _pad_to(adj, (Np, Np)).astype(jnp.int8)
    # h resident in VMEM as bf16, with a ones-column in the last padded lane so
    # the adj@h matmul also produces the in-degree.
    h_pad = _pad_to(h.astype(jnp.float32), (Np, Dp))
    h_pad = h_pad.at[:, Dp - 1].set(1.0)
    h_p = h_pad.astype(jnp.bfloat16)

    # Fused epilogue weights: [feat | pool] along the output axis (bf16 MXU operands).
    wsf = _pad_to(params["W_self_f"].astype(jnp.float32), (Dp, Fp))
    wsp = _pad_to(params["W_self_p"].astype(jnp.float32), (Dp, Ap))
    ws_c = jnp.concatenate([wsf, wsp], axis=1).astype(jnp.bfloat16)
    wnf = _pad_to(params["W_neigh_f"].astype(jnp.float32), (Dp, Fp))
    wnp_ = _pad_to(params["W_neigh_p"].astype(jnp.float32), (Dp, Ap))
    wn_c = jnp.concatenate([wnf, wnp_], axis=1).astype(jnp.bfloat16)
    bf = _pad_to(params["b_f"].reshape(1, -1).astype(jnp.float32), (1, Fp))
    bp = _pad_to(params["b_p"].reshape(1, -1).astype(jnp.float32), (1, Ap))
    b_c = jnp.concatenate([bf, bp], axis=1)

    vmem_limit = _vmem_limit_bytes()

    # ---- pass 1: SAGE mean-aggregation + feat / assignment / block-diagonal S ----
    s_full, s_t, feat = pl.pallas_call(
        functools.partial(_sage_assign_kernel, a_true=A, f_pad=Fp, dp=Dp, tm=tm, tn=tn),
        out_shape=(jax.ShapeDtypeStruct((Np, P), jnp.bfloat16),
                   jax.ShapeDtypeStruct((P, Np), jnp.bfloat16),
                   jax.ShapeDtypeStruct((Np, Fp), jnp.bfloat16)),
        grid_spec=pltpu.PrefetchScalarGridSpec(
            num_scalar_prefetch=0,
            grid=(gi, gj),
            in_specs=[
                pl.BlockSpec((tm, tn), lambda i, j: (i, j)),        # adj tile (int8)
                pl.BlockSpec((Np, Dp), lambda i, j: (0, 0)),        # h, VMEM-resident
                pl.BlockSpec((tm, 1), lambda i, j: (i, 0)),         # per-row graph id
                pl.BlockSpec((1, P), lambda i, j: (0, 0)),          # per-column graph id
                pl.BlockSpec((Ap, P), lambda i, j: (0, 0)),         # assign->block layout
                pl.BlockSpec((Dp, Fp + Ap), lambda i, j: (0, 0)),   # [W_self_f|W_self_p]
                pl.BlockSpec((Dp, Fp + Ap), lambda i, j: (0, 0)),   # [W_neigh_f|W_neigh_p]
                pl.BlockSpec((1, Fp + Ap), lambda i, j: (0, 0)),    # [b_f|b_p]
            ],
            out_specs=(
                pl.BlockSpec((tm, P), lambda i, j: (i, 0)),         # S rows
                pl.BlockSpec((P, tm), lambda i, j: (0, i)),         # S^T cols
                pl.BlockSpec((tm, Fp), lambda i, j: (i, 0)),        # feat rows
            ),
            scratch_shapes=[pltpu.VMEM((tm, Dp), jnp.float32)],     # adj@h accumulator
        ),
        compiler_params=pltpu.CompilerParams(
            dimension_semantics=("parallel", "arbitrary"),
            vmem_limit_bytes=vmem_limit),
    )(adj_p, h_p, gid, colgid, rep, ws_c, wn_c, b_c)

    # ---- pass 2: adj_new = S^T (adj S), h_new = S^T feat (split tiled reduction) --
    adj_parts, h_parts = pl.pallas_call(
        functools.partial(_pool_kernel, tn=tn),
        out_shape=(jax.ShapeDtypeStruct((n_split, P, P), jnp.float32),
                   jax.ShapeDtypeStruct((n_split, P, Fp), jnp.float32)),
        grid_spec=pltpu.PrefetchScalarGridSpec(
            num_scalar_prefetch=0,
            grid=(n_split, gi_pc, gj),
            in_specs=[
                pl.BlockSpec((P, tm), lambda c, i, j: (0, c * gi_pc + i)),   # S_i^T
                pl.BlockSpec((Np, P), lambda c, i, j: (0, 0)),               # S resident
                pl.BlockSpec((tm, tn), lambda c, i, j: (c * gi_pc + i, j)),  # adj tile
                pl.BlockSpec((tm, Fp), lambda c, i, j: (c * gi_pc + i, 0)),  # feat_i
            ],
            out_specs=(
                pl.BlockSpec((1, P, P), lambda c, i, j: (c, 0, 0)),
                pl.BlockSpec((1, P, Fp), lambda c, i, j: (c, 0, 0)),
            ),
        ),
        compiler_params=pltpu.CompilerParams(
            dimension_semantics=("parallel", "arbitrary", "arbitrary"),
            vmem_limit_bytes=vmem_limit),
    )(s_t, s_full, adj_p, feat)

    adj_new_p = jnp.sum(adj_parts, axis=0)
    h_new_p = jnp.sum(h_parts, axis=0)

    BA = B * A
    # TODO(synk): EntropyLoss / LinkPredLoss are side-effect-only entries in
    # self.loss_log (not returned by forward) and are intentionally not computed.
    return adj_new_p[:BA, :BA], h_new_p[:BA, :Fo]


def _diffpool_reference(h, adj, batch_num_nodes, params):
    """Pure-JAX f32 reference of the same forward pass (for validation)."""
    deg = jnp.maximum(jnp.sum(adj, axis=1, keepdims=True), 1.0)
    neigh = (adj @ h) / deg
    feat = jax.nn.relu(h @ params["W_self_f"] + neigh @ params["W_neigh_f"] + params["b_f"])
    logits = jax.nn.relu(h @ params["W_self_p"] + neigh @ params["W_neigh_p"] + params["b_p"])
    assign = jax.nn.softmax(logits, axis=1)
    B = len(batch_num_nodes)
    A = assign.shape[1]
    N = h.shape[0]
    offs = np.cumsum([0] + list(batch_num_nodes))
    s = jnp.zeros((N, B * A), jnp.float32)
    for g in range(B):
        s = s.at[offs[g]:offs[g + 1], g * A:(g + 1) * A].set(assign[offs[g]:offs[g + 1]])
    h_new = s.T @ feat
    adj_new = s.T @ (adj @ s)
    return adj_new, h_new


if __name__ == "__main__":
    # Small hyperparameters consistent with the module's forward.
    input_dim = 16          # embedding_dim
    assign_dim = 4          # pool_gc output dim (per graph, pre block_diag)
    output_feat_dim = 8     # feat_gc output dim
    batch_num_nodes = [80, 70]
    N = sum(batch_num_nodes)
    B = len(batch_num_nodes)

    key = jax.random.PRNGKey(0)
    k = jax.random.split(key, 7)

    h = jax.random.normal(k[0], (N, input_dim), jnp.float32)

    # Batched graph: block-structured random adjacency, no cross-graph edges.
    rng = np.random.default_rng(0)
    adj_np = np.zeros((N, N), np.float32)
    offs = np.cumsum([0] + batch_num_nodes)
    for g in range(B):
        s0, e0 = offs[g], offs[g + 1]
        blk = (rng.random((e0 - s0, e0 - s0)) < 0.15).astype(np.float32)
        np.fill_diagonal(blk, 0.0)
        adj_np[s0:e0, s0:e0] = blk
    adj = jnp.asarray(adj_np)

    def init_w(kk, fan_in, fan_out):
        return jax.random.normal(kk, (fan_in, fan_out), jnp.float32) / np.sqrt(fan_in)

    params = dict(
        W_self_f=init_w(k[1], input_dim, output_feat_dim),
        W_neigh_f=init_w(k[2], input_dim, output_feat_dim),
        b_f=0.1 * jax.random.normal(k[5], (1, output_feat_dim), jnp.float32),
        W_self_p=init_w(k[3], input_dim, assign_dim),
        W_neigh_p=init_w(k[4], input_dim, assign_dim),
        b_p=0.1 * jax.random.normal(k[6], (1, assign_dim), jnp.float32),
    )

    # tile_nodes=128 -> padded N=256, 2x2 grid and a 2-way pass-2 split,
    # exercising the tiled reductions and the megacore path.
    adj_new, h_new = diffpool_forward(h, adj, batch_num_nodes, params, tile_nodes=128)
    jax.block_until_ready((adj_new, h_new))

    assert adj_new.shape == (B * assign_dim, B * assign_dim)
    assert h_new.shape == (B * assign_dim, output_feat_dim)
    assert bool(jnp.all(jnp.isfinite(adj_new))) and bool(jnp.all(jnp.isfinite(h_new)))

    # Validate against the f32 reference (loose tol: bf16 matmul operands in-kernel).
    ref_adj, ref_h = _diffpool_reference(h, adj, batch_num_nodes, params)
    err_a = float(jnp.max(jnp.abs(adj_new - ref_adj)))
    err_h = float(jnp.max(jnp.abs(h_new - ref_h)))
    tol_a = 5e-2 * float(jnp.max(jnp.abs(ref_adj))) + 1e-2
    tol_h = 5e-2 * float(jnp.max(jnp.abs(ref_h))) + 1e-2
    assert err_a <= tol_a, (err_a, tol_a)
    assert err_h <= tol_h, (err_h, tol_h)
    print("KERNEL_OK")
</pallas_src>

<mosaic_0001>
module attributes {stable_mosaic.version = 11 : i64} {
  func.func @_sage_assign_kernel(%arg0: i32, %arg1: i32, %arg2: memref<128x128xi8, #tpu.memory_space<vmem>>, %arg3: memref<256x128xbf16, #tpu.memory_space<vmem>>, %arg4: memref<128x1xi32, #tpu.memory_space<vmem>>, %arg5: memref<1x128xi32, #tpu.memory_space<vmem>>, %arg6: memref<128x128xbf16, #tpu.memory_space<vmem>>, %arg7: memref<128x256xbf16, #tpu.memory_space<vmem>>, %arg8: memref<128x256xbf16, #tpu.memory_space<vmem>>, %arg9: memref<1x256xf32, #tpu.memory_space<vmem>>, %arg10: memref<128x128xbf16, #tpu.memory_space<vmem>>, %arg11: memref<128x128xbf16, #tpu.memory_space<vmem>>, %arg12: memref<128x128xbf16, #tpu.memory_space<vmem>>, %arg13: memref<128x128xf32, #tpu.memory_space<vmem>>) attributes {dimension_semantics = [#tpu.dimension_semantics<parallel>, #tpu.dimension_semantics<arbitrary>], iteration_bounds = array<i64: 2, 2>, scalar_prefetch = 0 : i64, scratch_operands = 1 : i64, tpu.core_type = #tpu.core_type<tc>, window_params = [{transform_indices = @transform_0, window_bounds = array<i64: 128, 128>}, {pipeline_mode = #tpu.pipeline_mode<synchronous>, transform_indices = @transform_1, window_bounds = array<i64: 256, 128>}, {transform_indices = @transform_2, window_bounds = array<i64: 128, 1>}, {pipeline_mode = #tpu.pipeline_mode<synchronous>, transform_indices = @transform_3, window_bounds = array<i64: 1, 128>}, {pipeline_mode = #tpu.pipeline_mode<synchronous>, transform_indices = @transform_4, window_bounds = array<i64: 128, 128>}, {pipeline_mode = #tpu.pipeline_mode<synchronous>, transform_indices = @transform_5, window_bounds = array<i64: 128, 256>}, {pipeline_mode = #tpu.pipeline_mode<synchronous>, transform_indices = @transform_6, window_bounds = array<i64: 128, 256>}, {pipeline_mode = #tpu.pipeline_mode<synchronous>, transform_indices = @transform_7, window_bounds = array<i64: 1, 256>}, {transform_indices = @transform_8, window_bounds = array<i64: 128, 128>}, {transform_indices = @transform_9, window_bounds = array<i64: 128, 128>}, {transform_indices = @transform_10, window_bounds = array<i64: 128, 128>}]} {
    %c0_i32 = arith.constant 0 : i32
    %0 = arith.cmpi eq, %arg1, %c0_i32 : i32
    %1 = arith.extui %0 : i1 to i32
    %c0_i32_0 = arith.constant 0 : i32
    %2 = arith.cmpi ne, %1, %c0_i32_0 : i32
    scf.if %2 {
      %cst_8 = arith.constant 0.000000e+00 : f32
      %16 = vector.broadcast %cst_8 : f32 to vector<128x128xf32>
      %c0_9 = arith.constant 0 : index
      %c0_10 = arith.constant 0 : index
      %17 = vector.load %arg13[%c0_9, %c0_10] : memref<128x128xf32, #tpu.memory_space<vmem>>, vector<128x128xf32>
      tpu.vector_store %arg13[%c0_9, %c0_10], %16 {strides = array<i32>} : memref<128x128xf32, #tpu.memory_space<vmem>>, vector<128x128xf32>,
    } else {
    }
    %c0 = arith.constant 0 : index
    %c0_1 = arith.constant 0 : index
    %3 = vector.load %arg2[%c0, %c0_1] : memref<128x128xi8, #tpu.memory_space<vmem>>, vector<128x128xi8>
    %4 = arith.sitofp %3 : vector<128x128xi8> to vector<128x128xbf16>
    %c128_i32 = arith.constant 128 : i32
    %5 = arith.muli %arg1, %c128_i32 : i32
    %6 = tpu.assume_multiple %5, 128 : i32
    %7 = arith.index_cast %6 : i32 to index
    %c0_2 = arith.constant 0 : index
    %8 = vector.load %arg3[%7, %c0_2] : memref<256x128xbf16, #tpu.memory_space<vmem>>, vector<128x128xbf16>
    %c0_3 = arith.constant 0 : index
    %c0_4 = arith.constant 0 : index
    %9 = vector.load %arg13[%c0_3, %c0_4] : memref<128x128xf32, #tpu.memory_space<vmem>>, vector<128x128xf32>
    %cst = arith.constant dense<0.000000e+00> : vector<128x128xf32>
    %10 = tpu.matmul %4, %8, %cst {dimension_numbers = #tpu.dot_dimension_numbers<[1], [0], [0], [1], [0, 0, 1, 1], [], []>} : vector<128x128xbf16>, vector<128x128xbf16>, vector<128x128xf32> -> vector<128x128xf32>
    %11 = arith.addf %9, %10 : vector<128x128xf32>
    %c0_5 = arith.constant 0 : index
    %c0_6 = arith.constant 0 : index
    %12 = vector.load %arg13[%c0_5, %c0_6] : memref<128x128xf32, #tpu.memory_space<vmem>>, vector<128x128xf32>
    tpu.vector_store %arg13[%c0_5, %c0_6], %11 {strides = array<i32>} : memref<128x128xf32, #tpu.memory_space<vmem>>, vector<128x128xf32>,
    %c1_i32 = arith.constant 1 : i32
    %13 = arith.cmpi eq, %arg1, %c1_i32 : i32
    %14 = arith.extui %13 : i1 to i32
    %c0_i32_7 = arith.constant 0 : i32
    %15 = arith.cmpi ne, %14, %c0_i32_7 : i32
    scf.if %15 {
      %c0_8 = arith.constant 0 : index
      %c0_9 = arith.constant 0 : index
      %16 = vector.load %arg13[%c0_8, %c0_9] : memref<128x128xf32, #tpu.memory_space<vmem>>, vector<128x128xf32>
      %17 = vector.extract_strided_slice %16 {offsets = [0, 127], sizes = [128, 1], strides = [1, 1]} : vector<128x128xf32> to vector<128x1xf32>
      %cst_10 = arith.constant 1.000000e+00 : f32
      %18 = vector.broadcast %cst_10 : f32 to vector<128x1xf32>
      %19 = arith.maximumf %17, %18 : vector<128x1xf32>
      %20 = vector.broadcast %19 : vector<128x1xf32> to vector<128x128xf32>
      %21 = arith.divf %16, %20 : vector<128x128xf32>
      %22 = arith.truncf %21 : vector<128x128xf32> to vector<128x128xbf16>
      %c128_i32_11 = arith.constant 128 : i32
      %23 = arith.muli %arg0, %c128_i32_11 : i32
      %24 = tpu.assume_multiple %23, 128 : i32
      %25 = arith.index_cast %24 : i32 to index
      %c0_12 = arith.constant 0 : index
      %26 = vector.load %arg3[%25, %c0_12] : memref<256x128xbf16, #tpu.memory_space<vmem>>, vector<128x128xbf16>
      %c0_13 = arith.constant 0 : index
      %c0_14 = arith.constant 0 : index
      %27 = vector.load %arg7[%c0_13, %c0_14] : memref<128x256xbf16, #tpu.memory_space<vmem>>, vector<128x256xbf16>
      %cst_15 = arith.constant dense<0.000000e+00> : vector<128x256xf32>
      %28 = tpu.matmul %26, %27, %cst_15 {dimension_numbers = #tpu.dot_dimension_numbers<[1], [0], [0], [1], [0, 0, 1, 1], [], []>} : vector<128x128xbf16>, vector<128x256xbf16>, vector<128x256xf32> -> vector<128x256xf32>
      %c0_16 = arith.constant 0 : index
      %c0_17 = arith.constant 0 : index
      %29 = vector.load %arg8[%c0_16, %c0_17] : memref<128x256xbf16, #tpu.memory_space<vmem>>, vector<128x256xbf16>
      %cst_18 = arith.constant dense<0.000000e+00> : vector<128x256xf32>
      %30 = tpu.matmul %22, %29, %cst_18 {dimension_numbers = #tpu.dot_dimension_numbers<[1], [0], [0], [1], [0, 0, 1, 1], [], []>} : vector<128x128xbf16>, vector<128x256xbf16>, vector<128x256xf32> -> vector<128x256xf32>
      %31 = arith.addf %28, %30 : vector<128x256xf32>
      %c0_19 = arith.constant 0 : index
      %c0_20 = arith.constant 0 : index
      %32 = vector.load %arg9[%c0_19, %c0_20] : memref<1x256xf32, #tpu.memory_space<vmem>>, vector<1x256xf32>
      %33 = vector.broadcast %32 : vector<1x256xf32> to vector<128x256xf32>
      %34 = arith.addf %31, %33 : vector<128x256xf32>
      %cst_21 = arith.constant 0.000000e+00 : f32
      %35 = vector.broadcast %cst_21 : f32 to vector<128x256xf32>
      %36 = arith.maximumf %34, %35 : vector<128x256xf32>
      %37 = vector.extract_strided_slice %36 {offsets = [0, 0], sizes = [128, 128], strides = [1, 1]} : vector<128x256xf32> to vector<128x128xf32>
      %38 = vector.extract_strided_slice %36 {offsets = [0, 128], sizes = [128, 128], strides = [1, 1]} : vector<128x256xf32> to vector<128x128xf32>
      %39 = tpu.iota {dimensions = array<i32: 1>} : vector<128x128xi32>
      %c4_i32 = arith.constant 4 : i32
      %40 = vector.broadcast %c4_i32 : i32 to vector<128x128xi32>
      %41 = arith.cmpi slt, %39, %40 : vector<128x128xi32>
      %cst_22 = arith.constant -1.000000e+30 : f32
      %42 = vector.broadcast %cst_22 : f32 to vector<128x128xf32>
      %43 = arith.select %41, %38, %42 : vector<128x128xi1>, vector<128x128xf32>
      %cst_23 = arith.constant dense<0xFF800000> : vector<128xf32>
      %44 = vector.multi_reduction <maximumf>, %43, %cst_23 [1] : vector<128x128xf32> to vector<128xf32>
      %45 = vector.shape_cast %44 : vector<128xf32> to vector<128x1xf32>
      %46 = vector.broadcast %45 : vector<128x1xf32> to vector<128x128xf32>
      %47 = arith.subf %43, %46 : vector<128x128xf32>
      %48 = math.exp %47 : vector<128x128xf32>
      %cst_24 = arith.constant dense<0.000000e+00> : vector<128xf32>
      %49 = vector.multi_reduction <add>, %48, %cst_24 [1] : vector<128x128xf32> to vector<128xf32>
      %50 = vector.shape_cast %49 : vector<128xf32> to vector<128x1xf32>
      %51 = vector.broadcast %50 : vector<128x1xf32> to vector<128x128xf32>
      %52 = arith.divf %48, %51 : vector<128x128xf32>
      %53 = arith.truncf %52 : vector<128x128xf32> to vector<128x128xbf16>
      %c0_25 = arith.constant 0 : index
      %c0_26 = arith.constant 0 : index
      %54 = vector.load %arg6[%c0_25, %c0_26] : memref<128x128xbf16, #tpu.memory_space<vmem>>, vector<128x128xbf16>
      %cst_27 = arith.constant dense<0.000000e+00> : vector<128x128xf32>
      %55 = tpu.matmul %53, %54, %cst_27 {dimension_numbers = #tpu.dot_dimension_numbers<[1], [0], [0], [1], [0, 0, 1, 1], [], []>} : vector<128x128xbf16>, vector<128x128xbf16>, vector<128x128xf32> -> vector<128x128xf32>
      %c0_28 = arith.constant 0 : index
      %c0_29 = arith.constant 0 : index
      %56 = vector.load %arg5[%c0_28, %c0_29] : memref<1x128xi32, #tpu.memory_space<vmem>>, vector<1x128xi32>
      %c0_30 = arith.constant 0 : index
      %c0_31 = arith.constant 0 : index
      %57 = vector.load %arg4[%c0_30, %c0_31] : memref<128x1xi32, #tpu.memory_space<vmem>>, vector<128x1xi32>
      %58 = vector.broadcast %56 : vector<1x128xi32> to vector<128x128xi32>
      %59 = vector.broadcast %57 : vector<128x1xi32> to vector<128x128xi32>
      %60 = arith.cmpi eq, %58, %59 : vector<128x128xi32>
      %cst_32 = arith.constant 0.000000e+00 : f32
      %61 = vector.broadcast %cst_32 : f32 to vector<128x128xf32>
      %62 = arith.select %60, %55, %61 : vector<128x128xi1>, vector<128x128xf32>
      %63 = arith.truncf %62 : vector<128x128xf32> to vector<128x128xbf16>
      %64 = arith.truncf %37 : vector<128x128xf32> to vector<128x128xbf16>
      %c0_33 = arith.constant 0 : index
      %c0_34 = arith.constant 0 : index
      %65 = vector.load %arg12[%c0_33, %c0_34] : memref<128x128xbf16, #tpu.memory_space<vmem>>, vector<128x128xbf16>
      tpu.vector_store %arg12[%c0_33, %c0_34], %64 {strides = array<i32>} : memref<128x128xbf16, #tpu.memory_space<vmem>>, vector<128x128xbf16>,
      %c0_35 = arith.constant 0 : index
      %c0_36 = arith.constant 0 : index
      %66 = vector.load %arg10[%c0_35, %c0_36] : memref<128x128xbf16, #tpu.memory_space<vmem>>, vector<128x128xbf16>
      tpu.vector_store %arg10[%c0_35, %c0_36], %63 {strides = array<i32>} : memref<128x128xbf16, #tpu.memory_space<vmem>>, vector<128x128xbf16>,
      %67 = tpu.transpose %63, [1, 0] : vector<128x128xbf16> -> vector<128x128xbf16>
      %c0_37 = arith.constant 0 : index
      %c0_38 = arith.constant 0 : index
      %68 = vector.load %arg11[%c0_37, %c0_38] : memref<128x128xbf16, #tpu.memory_space<vmem>>, vector<128x128xbf16>
      tpu.vector_store %arg11[%c0_37, %c0_38], %67 {strides = array<i32>} : memref<128x128xbf16, #tpu.memory_space<vmem>>, vector<128x128xbf16>,
    } else {
    }
    return
  }
  func.func @transform_0(%arg0: i32, %arg1: i32) -> (i32, i32) {
    %c0_i32 = arith.constant 0 : i32
    return %arg0, %arg1 : i32, i32
  }
  func.func @transform_1(%arg0: i32, %arg1: i32) -> (i32, i32) {
    %c0_i32 = arith.constant 0 : i32
    %c0_i32_0 = arith.constant 0 : i32
    %c0_i32_1 = arith.constant 0 : i32
    return %c0_i32, %c0_i32_0 : i32, i32
  }
  func.func @transform_2(%arg0: i32, %arg1: i32) -> (i32, i32) {
    %c0_i32 = arith.constant 0 : i32
    %c0_i32_0 = arith.constant 0 : i32
    return %arg0, %c0_i32 : i32, i32
  }
  func.func @transform_3(%arg0: i32, %arg1: i32) -> (i32, i32) {
    %c0_i32 = arith.constant 0 : i32
    %c0_i32_0 = arith.constant 0 : i32
    %c0_i32_1 = arith.constant 0 : i32
    return %c0_i32, %c0_i32_0 : i32, i32
  }
  func.func @transform_4(%arg0: i32, %arg1: i32) -> (i32, i32) {
    %c0_i32 = arith.constant 0 : i32
    %c0_i32_0 = arith.constant 0 : i32
    %c0_i32_1 = arith.constant 0 : i32
    return %c0_i32, %c0_i32_0 : i32, i32
  }
  func.func @transform_5(%arg0: i32, %arg1: i32) -> (i32, i32) {
    %c0_i32 = arith.constant 0 : i32
    %c0_i32_0 = arith.constant 0 : i32
    %c0_i32_1 = arith.constant 0 : i32
    return %c0_i32, %c0_i32_0 : i32, i32
  }
  func.func @transform_6(%arg0: i32, %arg1: i32) -> (i32, i32) {
    %c0_i32 = arith.constant 0 : i32
    %c0_i32_0 = arith.constant 0 : i32
    %c0_i32_1 = arith.constant 0 : i32
    return %c0_i32, %c0_i32_0 : i32, i32
  }
  func.func @transform_7(%arg0: i32, %arg1: i32) -> (i32, i32) {
    %c0_i32 = arith.constant 0 : i32
    %c0_i32_0 = arith.constant 0 : i32
    %c0_i32_1 = arith.constant 0 : i32
    return %c0_i32, %c0_i32_0 : i32, i32
  }
  func.func @transform_8(%arg0: i32, %arg1: i32) -> (i32, i32) {
    %c0_i32 = arith.constant 0 : i32
    %c0_i32_0 = arith.constant 0 : i32
    return %arg0, %c0_i32 : i32, i32
  }
  func.func @transform_9(%arg0: i32, %arg1: i32) -> (i32, i32) {
    %c0_i32 = arith.constant 0 : i32
    %c0_i32_0 = arith.constant 0 : i32
    return %c0_i32, %arg0 : i32, i32
  }
  func.func @transform_10(%arg0: i32, %arg1: i32) -> (i32, i32) {
    %c0_i32 = arith.constant 0 : i32
    %c0_i32_0 = arith.constant 0 : i32
    return %arg0, %c0_i32 : i32, i32
  }
}

</mosaic_0001>

<bundles_post_ra>
// kernel: tpu_custom_call.1
= control target key start
LH: loop header
LB: loop body
LE: loop exit
PB: predicated region body
PF: predicated region fallthrough
CT: control target
= control target key end

     0   :  { %s4890_s0 = inlined_call_operand.vmem [shape: s8[256,256], index: 0, kind: input, shape index: {}]   ;;  %s4891_s1 = inlined_call_operand.vmem [shape: bf16[256,128], index: 1, kind: input, shape index: {}]   ;;  %s4892_s2 = inlined_call_operand.vmem [shape: s32[256,1], index: 2, kind: input, shape index: {}]   ;;  %s4893_s3 = inlined_call_operand.vmem [shape: s32[1,128], index: 3, kind: input, shape index: {}]   ;;  %s4894_s4 = inlined_call_operand.hbm [shape: bf16[128,128], index: 4, kind: input, shape index: {}]   ;;  %s4895_s5 = inlined_call_operand.hbm [shape: bf16[128,256], index: 5, kind: input, shape index: {}]   ;;  %s4896_s6 = inlined_call_operand.hbm [shape: bf16[128,256], index: 6, kind: input, shape index: {}]   ;;  %s4897_s7 = inlined_call_operand.vmem [shape: f32[1,256], index: 7, kind: input, shape index: {}]   ;;  %s4898_s8 = inlined_call_operand.hbm [shape: bf16[256,128], index: 8, kind: output, shape index: {0}]   ;;  %s4899_s9 = inlined_call_operand.hbm [shape: bf16[128,256], index: 9, kind: output, shape index: {1}]   ;;  %s4900_s10 = inlined_call_operand.hbm [shape: bf16[256,128], index: 10, kind: output, shape index: {2}]  }
   0x1   :  { %4917 = sst [smem:[#allocation29_spill]] %s4890_s0 }
   0x2   :  { %4918 = sst [smem:[#allocation30_spill]] %s4891_s1 }
   0x3   :  { %4919 = sst [smem:[#allocation31_spill]] %s4892_s2 }
   0x4   :  { %4920 = sst [smem:[#allocation32_spill]] %s4893_s3 }
   0x5   :  { %4921 = sst [smem:[#allocation33_spill]] %s4894_s4 }
   0x6   :  { %4922 = sst [smem:[#allocation34_spill]] %s4895_s5 }
   0x7   :  { %4923 = sst [smem:[#allocation35_spill]] %s4896_s6 }
   0x8   :  { %4924 = sst [smem:[#allocation36_spill]] %s4897_s7 }
   0x9   :  { %4925 = sst [smem:[#allocation37_spill]] %s4898_s8 }
   0xa   :  { %4926 = sst [smem:[#allocation38_spill]] %s4899_s9 }
   0xb   :  { %4927 = sst [smem:[#allocation39_spill]] %s4900_s10 }
   0xc   :  { %16 = vsyncpa [#allocation5], 0 }
   0xd   :  { %17 = vsyncpa [#allocation8], 0 }
   0xe   :  { %18 = vsyncpa [#allocation6], 0 }
   0xf   :  { %20 = vsyncpa [#allocation6 + $0x1], 0 }
  0x10   :  { %21 = vsyncpa [#allocation12], 0 }
  0x11   :  { %23 = vsyncpa [#allocation12 + $0x1], 0  ;;  %s3717_s13 = smov 0   ;;  %s3719_s14 = smov 0  }
  0x12   :  { %s3721_s15 = smov 0   ;;  %s3723_s16 = smov 0  }
  0x13   :  { %s3725_s17 = smov 0   ;;  %s3727_s18 = smov 0  }
  0x14   :  { %s3729_s19 = smov 0   ;;  %s3731_s20 = smov 0  }
  0x15   :  { %s3733_s21 = smov 0   ;;  %s3735_s22 = smov 0  }
  0x16 LB: > { %4928 = sst [smem:[#allocation18_spill]] %s3611_s13  ;;  %s3768_s23 = sadd.s32 4294967295, %s3647_s22   ;;  %s3647_s22 = sphi %s3735_s22, %s29_s22   ;;  %s3643_s21 = sphi %s3733_s21, %s5019_s21   ;;  %s3639_s20 = sphi %s3731_s20, %s5018_s20   ;;  %s3635_s19 = sphi %s3729_s19, %s5017_s19   ;;  %s3631_s18 = sphi %s3727_s18, %s5016_s18   ;;  %s3627_s17 = sphi %s3725_s17, %s5023_s17   ;;  %s3623_s16 = sphi %s3723_s16, %s5022_s16   ;;  %s3619_s15 = sphi %s3721_s15, %s5014_s15   ;;  %s3615_s14 = sphi %s3719_s14, %s5021_s14   ;;  %s3611_s13 = sphi %s3717_s13, %s5020_s13  }
  0x17   : > { %4929 = sst [smem:[#allocation19_spill]] %s3619_s15  ;;  %s4906_s24 = sadd.s32 4294967294, %s3647_s22  }
  0x18   : > { %4930 = sst [smem:[#allocation20_spill]] %s3631_s18  ;;  %s38_s25 = sadd.s32 1, %s3639_s20 }
  0x19   : > { %4931 = sst [smem:[#allocation21_spill]] %s3639_s20  ;;  %s41_s26 = sadd.s32 1, %s3643_s21 }
  0x1a   : > { %4932 = sst [smem:[#allocation22_spill]] %s3643_s21  ;;  %p39_p0 = scmp.ge.s32.totalorder %s38_s25, 2 }
  0x1b   : > { %s50_s27 = sadd.s32 1, %s3627_s17  ;;  %p57_p1 = scmp.ne.s32.totalorder %s3627_s17, %s3623_s16 }
  0x1c   : > { %p58_p2 = scmp.eq.s32.totalorder %s3647_s22, 0  ;;  %s5025_s25 = smov (%p39_p0, %s38_s25), 0 }
  0x1d   : > { %4933 = sst [smem:[#allocation23_spill]] %s5025_s25  ;;  %s5027_s26 = smov (!%p39_p0, %s41_s26), %s3643_s21 }
  0x1e   : > { %s46_s28 = ssub.s32 %s3639_s20, %s5025_s25  ;;  %p3782_p3 = por %p58_p2, %p57_p1 }
  0x1f   : > { %p43_p4 = scmp.ge.s32.totalorder %s5027_s26, 2  ;;  %s228_s30 = sadd.s32 1, %s3619_s15 }
  0x20   : > { %p238_p5 = scmp.ne.s32.totalorder %s3619_s15, %s3615_s14  ;;  %p239_p6 = scmp.eq.s32.totalorder %s3768_s23, 3 }
  0x21   : > { %s5029_s26 = smov (%p43_p4, %s5027_s26), 0  ;;  %p244_p8 = scmp.ne.s32.totalorder %s3615_s14, %s3611_s13 }
  0x22   : > { %4935 = sst [smem:[#allocation24_spill]] %s5029_s26  ;;  %p3792_p7 = por %p239_p6, %p238_p5 }
  0x23   : > { %s45_s12 = ssub.s32 %s3643_s21, %s5029_s26  ;;  %p245_p9 = scmp.eq.s32.totalorder %s4906_s24, 3 }
  0x24   : > { %s4936_s11 = scalar_select %p3792_p7, 1, 0 }
  0x25   : > { %s47_s25 = sor.u32 %s46_s28, %s45_s12  ;;  %p226_p10 = scmp.eq.s32.totalorder %s45_s12, 0 }
  0x26   : > { %4937 = sst [smem:[#allocation25_spill]] %s4936_s11  ;;  %p48_p11 = scmp.eq.s32.totalorder %s47_s25, 0 }
  0x27   : > { %p3802_p12 = por %p245_p9, %p244_p8  ;;  %p2678_p13 = scmp.ge.s32.totalorder %s3647_s22, 1 }
  0x28   : > { %s3807_s8 = scalar_select %p226_p10, %s3619_s15, %s228_s30  }
  0x29   : > { %s4938_s10 = scalar_select %p3802_p12, 1, 0 }
  0x2a   : > { %4940 = sst [smem:[#allocation27_spill]] %s3807_s8  ;;  %p304_p0 = scmp.lt.s32.totalorder %s3647_s22, 5 }
  0x2b   : > { %4939 = sst [smem:[#allocation26_spill]] %s4938_s10  ;;  %p3176_p1 = scmp.eq.s32.totalorder %s3768_s23, 0 }
  0x2c   : > { %s3810_s9 = scalar_select %p48_p11, %s3627_s17, %s50_s27  }
  0x2d   : > { %p3815_p2 = pnand %p2678_p13, %p304_p0  ;;  %s4943_s5 = sld [smem:[#allocation34_spill]] }
  0x2e   : > { %4941 = sst [smem:[#allocation28_spill]] %s3810_s9  ;;  %s3649_s12 = smov [#allocation7]  }
  0x2f   : > { %p3156_p4 = pneg %p3815_p2  ;;  %s337_s30 = sshll.u32 %s3649_s12, 4  ;;  %s338_s30 = int_to_ptr.vmem [resolvable:$true] %s337_s30 }
  0x30   : > { %s3650_s26 = smov 128   ;;  %s3651_s9 = smov 8  }
  0x31   : > { %p3826_p5 = pnand %p3176_p1, %p3156_p4  ;;  %s4945_s4 = sld [smem:[#allocation33_spill]] }
  0x32   : > { %s3652_s8 = smov [#allocation4]   ;;  %s3653_s15 = smov 64  }
  0x33   : > { %s335_s25 = sshll.u32 %s4943_s5, 4  ;;  %s323_s12 = sshll.u32 %s3652_s8, 4  ;;  %s336_s25 = int_to_ptr.hbm [resolvable:$true] %s335_s25  ;;  %s324_s12 = int_to_ptr.vmem [resolvable:$true] %s323_s12 }
  0x34   : > { %3162 = dma.hbm_to_vmem [thread:$0]  (!%p3826_p5), %s336_s25, 2048, %s338_s30, [#allocation8], %s3650_s26, %s3650_s26, %s3651_s9  }
  0x35   : > { %s3654_s10 = smov 4   ;;  %s4946_s6 = sld [smem:[#allocation35_spill]] }
  0x36   : > { %s3655_s1 = smov [#allocation9]   ;;  %p2682_p6 = scmp.ge.s32.totalorder %s3647_s22, 4 }
  0x37   : > { %s321_s5 = sshll.u32 %s4945_s4, 4  ;;  %s351_s18 = sshll.u32 %s3655_s1, 4  ;;  %s322_s5 = int_to_ptr.hbm [resolvable:$true] %s321_s5  ;;  %s352_s18 = int_to_ptr.vmem [resolvable:$true] %s351_s18 }
  0x38   : > { %3159 = dma.hbm_to_vmem [thread:$0]  (!%p3826_p5), %s322_s5, 1024, %s324_s12, [#allocation5], %s3653_s15, %s3653_s15, %s3654_s10  }
  0x39   : > { %364 = sbr.rel (%p2682_p6) target bundleno = 76 (0x4c), region = 40 }
  0x3b   : > { %s349_s7 = sshll.u32 %s4946_s6, 4  ;;  %s350_s7 = int_to_ptr.hbm [resolvable:$true] %s349_s7 }
  0x3c   : > { %3165 = dma.hbm_to_vmem [thread:$0]  (!%p3826_p5), %s350_s7, 2048, %s352_s18, [#allocation8], %s3650_s26, %s3650_s26, %s3651_s9  }
  0x3e   : > { %367 = sbr.rel (!%p3782_p3) target bundleno = 76 (0x4c), region = 44  ;;  %s369_s5 = sand.u32 (%p3782_p3), 1, %s3627_s17  }
  0x3f   : > { %s2937_s8 = sshll.u32 (%p3782_p3), %s3643_s21, 3  ;;  %s2683_s10 = sshll.u32 (%p3782_p3), %s369_s5, 5 }
  0x40   : > { %s374_s3 = sadd.s32 (%p3782_p3), %s3639_s20, %s2937_s8  ;;  %s4947_s0 = sld [smem:[#allocation29_spill]] (%p3782_p3) }
  0x41   : > { %s2686_s15 = sshll.u32 (%p3782_p3), %s374_s3, 3  ;;  %s371_s7 = scalar_lea.vmem (%p3782_p3), [#allocation3], %s2683_s10 }
  0x46   : > { %s376_s1 = scalar_lea.vmem %s4947_s0, %s2686_s15 }
  0x47   : > { %v411_v0 = vld [vmem:[%s376_s1] sm:$0xff]  ;;  %v413_v1 = vld [vmem:[%s376_s1 + $0x10] sm:$0xff] }
  0x48   : > { %v415_v2 = vld [vmem:[%s376_s1 + $0x20] sm:$0xff]  ;;  %412 = vst [vmem:[%s371_s7] sm:$0xff] %v411_v0  ;;  %v417_v3 = vld [vmem:[%s376_s1 + $0x30] sm:$0xff] }
  0x49   : > { %414 = vst [vmem:[%s371_s7 + $0x8] sm:$0xff] %v413_v1 }
  0x4a   : > { %416 = vst [vmem:[%s371_s7 + $0x10] sm:$0xff] %v415_v2 }
  0x4b   : > { %418 = vst [vmem:[%s371_s7 + $0x18] sm:$0xff] %v417_v3 }
  0x4c PF: > { %436 = sbr.rel (%p3815_p2) target bundleno = 1451 (0x5ab), region = 86  ;;  %s439_s9 = sand.u32 (!%p3815_p2), 1, %s3623_s16  }
  0x4d   : > { %s2688_s18 = sshll.u32 (!%p3815_p2), %s439_s9, 5 }
  0x4e   : > { %s3854_s26 = scalar_lea.vmem (!%p3815_p2), [#allocation3], %s2688_s18 }
  0x51   : > { %3594 = dma.done.wait (%p3176_p1), [#allocation5], 1024  }
  0x52   : > { %3596 = vsyncadd (%p3176_p1), [#allocation5], 4294966272 }
  0x53   : > { %3598 = dma.done.wait (%p3176_p1), [#allocation8], 4096  }
  0x54   : > { %3600 = vsyncadd (%p3176_p1), [#allocation8], 4294963200  ;;  %s4913_s13 = sand.u32 1, %s3615_s14   ;;  %s2695_s29 = sshll.u32 %s3635_s19, 4 }
  0x55   : > { %s2692_s16 = sshll.u32 %s4913_s13, 6  ;;  %p508_p3 = scmp.lt.s32.totalorder %s2695_s29, 31 }
  0x56   : > { %s4948_s2 = sld [smem:[#allocation31_spill]]  ;;  %s3873_s12 = scalar_lea.vmem [#allocation10], %s2692_s16 }
  0x57   : > { %s5031_s29 = smov (!%p508_p3, %s2695_s29), 31  ;;  %s3875_s5 = scalar_lea.vmem [#allocation11], %s2692_s16 }
  0x58   : > { %s2696_s30 = sshll.u32 %s5031_s29, 3  ;;  %s3877_s8 = scalar_lea.vmem [#allocation13], %s2692_s16 }
  0x59   : > { %s4949_s10 = sld [smem:[#allocation20_spill]] }
  0x5c   : > { %s3871_s28 = scalar_lea.vmem %s4948_s2, %s2696_s30 }
  0x5f   : > { %p2697_p8 = scmp.ne.s32.totalorder %s4949_s10, 0 }
  0x61   : > { %518 = sbr.rel (%p2697_p8) target bundleno = 119 (0x77), region = 106 }
  0x66   : > { %v3656_v4 = vmov 0.0  }
  0x67   : > { %519 = vst [vmem:[#allocation2 + $0x30] sm:$0xff] %v3656_v4 }
  0x68   : > { %520 = vst [vmem:[#allocation2] sm:$0xff] %v3656_v4 }
  0x69   : > { %521 = vst [vmem:[#allocation2 + $0x58] sm:$0xff] %v3656_v4 }
  0x6a   : > { %522 = vst [vmem:[#allocation2 + $0x18] sm:$0xff] %v3656_v4 }
  0x6b   : > { %523 = vst [vmem:[#allocation2 + $0x50] sm:$0xff] %v3656_v4 }
  0x6c   : > { %524 = vst [vmem:[#allocation2 + $0x68] sm:$0xff] %v3656_v4 }
  0x6d   : > { %525 = vst [vmem:[#allocation2 + $0x8] sm:$0xff] %v3656_v4 }
  0x6e   : > { %526 = vst [vmem:[#allocation2 + $0x48] sm:$0xff] %v3656_v4 }
  0x6f   : > { %527 = vst [vmem:[#allocation2 + $0x40] sm:$0xff] %v3656_v4 }
  0x70   : > { %528 = vst [vmem:[#allocation2 + $0x20] sm:$0xff] %v3656_v4 }
  0x71   : > { %529 = vst [vmem:[#allocation2 + $0x10] sm:$0xff] %v3656_v4 }
  0x72   : > { %530 = vst [vmem:[#allocation2 + $0x38] sm:$0xff] %v3656_v4 }
  0x73   : > { %531 = vst [vmem:[#allocation2 + $0x60] sm:$0xff] %v3656_v4 }
  0x74   : > { %532 = vst [vmem:[#allocation2 + $0x70] sm:$0xff] %v3656_v4 }
  0x75   : > { %533 = vst [vmem:[#allocation2 + $0x78] sm:$0xff] %v3656_v4 }
  0x76   : > { %534 = vst [vmem:[#allocation2 + $0x28] sm:$0xff] %v3656_v4 }
  0x77 PF: > { %s4950_s3 = sld [smem:[#allocation20_spill]]  ;;  %v535_v11 = vld [vmem:[%s3854_s26] sm:$0xff]  ;;  %v536_v12 = vld [vmem:[%s3854_s26 + $0x8] sm:$0xff]  ;;  %v537_v13 = vld [vmem:[%s3854_s26 + $0x10] sm:$0xff] }
  0x78   : > { %s4951_s9 = sld [smem:[#allocation30_spill]]  ;;  %v538_v14 = vld [vmem:[%s3854_s26 + $0x18] sm:$0xff]  ;;  %v539_v15 = vunpack.c.0.s8 %v535_v11  ;;  %v540_v16 = vunpack.c.1.s8 %v535_v11  ;;  %v543_v17 = vunpack.c.0.s8 %v536_v12  ;;  %v544_v18 = vunpack.c.1.s8 %v536_v12  ;;  %v600_v57 = vld [vmem:[#allocation2 + $0x30] sm:$0xff]  ;;  %v608_v63 = vld [vmem:[#allocation2 + $0x40] sm:$0xff] }
  0x79   : > { %v547_v20 = vunpack.c.0.s8 %v537_v13  ;;  %v548_v21 = vunpack.c.1.s8 %v537_v13  ;;  %v551_v22 = vunpack.c.0.s8 %v538_v14  ;;  %v552_v23 = vunpack.c.1.s8 %v538_v14  ;;  %v604_v58 = vld [vmem:[#allocation2 + $0x50] sm:$0xff]  ;;  %v601_v1 = vld [vmem:[#allocation2] sm:$0xff]  ;;  %v605_v2 = vld [vmem:[#allocation2 + $0x68] sm:$0xff] }
  0x7a   : > { %v555_v24 = vcvt.s32.f32 %v539_v15  ;;  %v556_v25 = vcvt.s32.f32 %v540_v16  ;;  %v559_v26 = vcvt.s32.f32 %v543_v17  ;;  %v560_v27 = vcvt.s32.f32 %v544_v18  ;;  %v612_v0 = vld [vmem:[#allocation2 + $0x60] sm:$0xff] }
  0x7b   : > { %v563_v29 = vcvt.s32.f32 %v547_v20  ;;  %v564_v30 = vcvt.s32.f32 %v548_v21  ;;  %v567_v31 = vcvt.s32.f32 %v551_v22  ;;  %v568_v32 = vcvt.s32.f32 %v552_v23  ;;  %v610_v23 = vld [vmem:[#allocation2 + $0x10] sm:$0xff] }
  0x7c   : > { %v571_v33 = vpack.c.bf16 %v556_v25, %v555_v24  ;;  %v573_v34 = vpack.c.bf16 %v560_v27, %v559_v26  ;;  %v541_v37 = vunpack.c.2.s8 %v535_v11  ;;  %v542_v38 = vunpack.c.3.s8 %v535_v11  ;;  %v609_v11 = vld [vmem:[#allocation2 + $0x20] sm:$0xff]  ;;  %v614_v24 = vld [vmem:[#allocation2 + $0x78] sm:$0xff]  ;;  %v607_v26 = vld [vmem:[#allocation2 + $0x48] sm:$0xff] }
  0x7d   : > { %s2698_s15 = sshll.u32 %s4950_s3, 7  ;;  %v575_v35 = vpack.c.bf16 %v564_v30, %v563_v29  ;;  %v577_v36 = vpack.c.bf16 %v568_v32, %v567_v31  ;;  %v545_v39 = vunpack.c.2.s8 %v536_v12  ;;  %v546_v40 = vunpack.c.3.s8 %v536_v12  ;;  %v613_v12 = vld [vmem:[#allocation2 + $0x70] sm:$0xff]  ;;  %v603_v25 = vld [vmem:[#allocation2 + $0x18] sm:$0xff]  ;;  %p2732_p9 = scmp.ne.s32.totalorder %s4950_s3, 1 }
  0x7e   : > { %s580_s11 = sshra.s32 %s2698_s15, 3  ;;  %v549_v41 = vunpack.c.2.s8 %v537_v13  ;;  %v550_v42 = vunpack.c.3.s8 %v537_v13  ;;  %v553_v43 = vunpack.c.2.s8 %v538_v14  ;;  %v554_v44 = vunpack.c.3.s8 %v538_v14  ;;  %v602_v13 = vld [vmem:[#allocation2 + $0x58] sm:$0xff]  ;;  %v606_v14 = vld [vmem:[#allocation2 + $0x8] sm:$0xff]  ;;  %s2733_s26 = sshll.u32 (!%p2732_p9), %s3635_s19, 7 }
  0x7f   : > { %s2699_s25 = sshll.u32 %s580_s11, 2  ;;  %v557_v45 = vcvt.s32.f32 %v541_v37  ;;  %v558_v46 = vcvt.s32.f32 %v542_v38  ;;  %v561_v47 = vcvt.s32.f32 %v545_v39  ;;  %v562_v48 = vcvt.s32.f32 %v546_v40  ;;  %s1110_s29 = sshra.s32 (!%p2732_p9), %s2733_s26, 3 }
  0x80   : > { %s3884_s18 = scalar_lea.vmem %s4951_s9, %s2699_s25  ;;  %v565_v49 = vcvt.s32.f32 %v549_v41  ;;  %v566_v50 = vcvt.s32.f32 %v550_v42  ;;  %v569_v51 = vcvt.s32.f32 %v553_v43  ;;  %v570_v52 = vcvt.s32.f32 %v554_v44  ;;  %s2734_s16 = sshll.u32 (!%p2732_p9), %s1110_s29, 2 }
  0x81   : > { %v2945_v5 = vld [vmem:[%s3884_s18 + $0x38] sm:$0xff]  ;;  %v2944_v6 = vld [vmem:[%s3884_s18 + $0x30] sm:$0xff]  ;;  %v2943_v7 = vld [vmem:[%s3884_s18 + $0x28] sm:$0xff]  ;;  %v572_v53 = vpack.c.bf16 %v558_v46, %v557_v45  ;;  %v574_v54 = vpack.c.bf16 %v562_v48, %v561_v47  ;;  %s4996_s24 = sld [smem:[#allocation30_spill]] (!%p2732_p9) }
  0x82   : > { %664 = vmatpush.bf16.msra.mxu0 %v2945_v5  ;;  %3090 = vmatpush.bf16.msra.mxu1 %v2945_v5  ;;  %v2942_v8 = vld [vmem:[%s3884_s18 + $0x20] sm:$0xff]  ;;  %v2941_v9 = vld [vmem:[%s3884_s18 + $0x18] sm:$0xff]  ;;  %v2940_v10 = vld [vmem:[%s3884_s18 + $0x10] sm:$0xff]  ;;  %v576_v55 = vpack.c.bf16 %v566_v50, %v565_v49  ;;  %v578_v56 = vpack.c.bf16 %v570_v52, %v569_v51  ;;  %s4999_s11 = sld [smem:[#allocation36_spill]] (!%p2732_p9) }
  0x83   : > { %3091 = vmatpush.bf16.msra.mxu2 %v2945_v5  ;;  %3092 = vmatpush.bf16.msra.mxu3 %v2945_v5  ;;  %v2939_v19 = vld [vmem:[%s3884_s18 + $0x8] sm:$0xff]  ;;  %v2938_v28 = vld [vmem:[%s3884_s18] sm:$0xff]  ;;  %s5002_s1 = sld [smem:[#allocation32_spill]] (!%p2732_p9) }
  0x86   : > { %665 = vmatpush.bf16.msra.mxu0 %v2944_v6  ;;  %3093 = vmatpush.bf16.msra.mxu1 %v2944_v6 }
  0x87   : > { %3094 = vmatpush.bf16.msra.mxu2 %v2944_v6  ;;  %3095 = vmatpush.bf16.msra.mxu3 %v2944_v6  ;;  %s4415_s10 = scalar_lea.vmem (!%p2732_p9), %s4996_s24, %s2734_s16 }
  0x8a   : > { %666 = vmatpush.bf16.msra.mxu0 %v2943_v7  ;;  %3096 = vmatpush.bf16.msra.mxu1 %v2943_v7 }
  0x8b   : > { %3097 = vmatpush.bf16.msra.mxu2 %v2943_v7  ;;  %3098 = vmatpush.bf16.msra.mxu3 %v2943_v7 }
  0x8e   : > { %667 = vmatpush.bf16.msra.mxu0 %v2942_v8  ;;  %3099 = vmatpush.bf16.msra.mxu1 %v2942_v8 }
  0x8f   : > { %3100 = vmatpush.bf16.msra.mxu2 %v2942_v8  ;;  %3101 = vmatpush.bf16.msra.mxu3 %v2942_v8 }
  0x92   : > { %668 = vmatpush.bf16.msra.mxu0 %v2941_v9  ;;  %3102 = vmatpush.bf16.msra.mxu1 %v2941_v9 }
  0x93   : > { %3103 = vmatpush.bf16.msra.mxu2 %v2941_v9  ;;  %3104 = vmatpush.bf16.msra.mxu3 %v2941_v9 }
  0x96   : > { %669 = vmatpush.bf16.msra.mxu0 %v2940_v10  ;;  %3105 = vmatpush.bf16.msra.mxu1 %v2940_v10 }
  0x97   : > { %3106 = vmatpush.bf16.msra.mxu2 %v2940_v10  ;;  %3107 = vmatpush.bf16.msra.mxu3 %v2940_v10 }
  0x9a   : > { %670 = vmatpush.bf16.msra.mxu0 %v2939_v19  ;;  %3108 = vmatpush.bf16.msra.mxu1 %v2939_v19 }
  0x9b   : > { %3109 = vmatpush.bf16.msra.mxu2 %v2939_v19  ;;  %3110 = vmatpush.bf16.msra.mxu3 %v2939_v19 }
  0x9e   : > { %671 = vmatpush.bf16.msra.mxu0 %v2938_v28  ;;  %3111 = vmatpush.bf16.msra.mxu1 %v2938_v28 }
  0x9f   : > { %3112 = vmatpush.bf16.msra.mxu2 %v2938_v28  ;;  %3113 = vmatpush.bf16.msra.mxu3 %v2938_v28 }
  0xa1   : > { %672 = vmatmul.bf16.vlgmr.msra.gmra.mxu0 %v571_v33  ;;  %682 = vmatmul.bf16.vlgmr.msra.gmra.mxu1 %v573_v34 }
  0xa2   : > { %692 = vmatmul.bf16.vlgmr.msra.gmra.mxu2 %v575_v35  ;;  %702 = vmatmul.bf16.vlgmr.msra.gmra.mxu3 %v577_v36  ;;  %v611_v35 = vld [vmem:[#allocation2 + $0x38] sm:$0xff]  ;;  %v615_v36 = vld [vmem:[#allocation2 + $0x28] sm:$0xff] }
  0xb1   : > { %677 = vmatmul.bf16.gmra.mxu0 %v572_v53  ;;  %687 = vmatmul.bf16.gmra.mxu1 %v574_v54 }
  0xb2   : > { %697 = vmatmul.bf16.gmra.mxu2 %v576_v55  ;;  %707 = vmatmul.bf16.gmra.mxu3 %v578_v56 }
 0x11e   : > { %v673_v59 = vpop.f32.mrf.mxu0  ;;  %v683_v60 = vpop.f32.mrf.mxu1 }
 0x11f   : > { %v713_v61 = vadd.f32 %v673_v59, %v600_v57  ;;  %v717_v62 = vadd.f32 %v683_v60, %v604_v58 }
 0x121   : > { %729 = vst [vmem:[#allocation2 + $0x30] sm:$0xff] %v713_v61 }
 0x122   : > { %733 = vst [vmem:[#allocation2 + $0x50] sm:$0xff] %v717_v62 }
 0x125   : > { %v693_v3 = vpop.f32.mrf.mxu2  ;;  %v703_v4 = vpop.f32.mrf.mxu3 }
 0x126   : > { %v721_v5 = vadd.f32 %v693_v3, %v608_v63  ;;  %v725_v6 = vadd.f32 %v703_v4, %v612_v0  ;;  %v675_v7 = vpop.f32.mrf.mxu0  ;;  %v685_v8 = vpop.f32.mrf.mxu1 }
 0x127   : > { %v714_v9 = vadd.f32 %v675_v7, %v601_v1  ;;  %v718_v10 = vadd.f32 %v685_v8, %v605_v2 }
 0x128   : > { %737 = vst [vmem:[#allocation2 + $0x40] sm:$0xff] %v721_v5 }
 0x129   : > { %741 = vst [vmem:[#allocation2 + $0x60] sm:$0xff] %v725_v6 }
 0x12a   : > { %730 = vst [vmem:[#allocation2] sm:$0xff] %v714_v9 }
 0x12b   : > { %734 = vst [vmem:[#allocation2 + $0x68] sm:$0xff] %v718_v10 }
 0x12d   : > { %v695_v15 = vpop.f32.mrf.mxu2  ;;  %v705_v16 = vpop.f32.mrf.mxu3 }
 0x12e   : > { %v722_v17 = vadd.f32 %v695_v15, %v609_v11  ;;  %v726_v18 = vadd.f32 %v705_v16, %v613_v12  ;;  %v678_v19 = vpop.f32.mrf.mxu0  ;;  %v688_v20 = vpop.f32.mrf.mxu1 }
 0x12f   : > { %v715_v21 = vadd.f32 %v678_v19, %v602_v13  ;;  %v719_v22 = vadd.f32 %v688_v20, %v606_v14 }
 0x130   : > { %738 = vst [vmem:[#allocation2 + $0x20] sm:$0xff] %v722_v17 }
 0x131   : > { %742 = vst [vmem:[#allocation2 + $0x70] sm:$0xff] %v726_v18 }
 0x132   : > { %731 = vst [vmem:[#allocation2 + $0x58] sm:$0xff] %v715_v21 }
 0x133   : > { %735 = vst [vmem:[#allocation2 + $0x8] sm:$0xff] %v719_v22 }
 0x135   : > { %v698_v27 = vpop.f32.mrf.mxu2  ;;  %v708_v28 = vpop.f32.mrf.mxu3 }
 0x136   : > { %v723_v29 = vadd.f32 %v698_v27, %v610_v23  ;;  %v727_v30 = vadd.f32 %v708_v28, %v614_v24  ;;  %v680_v31 = vpop.f32.mrf.mxu0  ;;  %v690_v32 = vpop.f32.mrf.mxu1 }
 0x137   : > { %v716_v33 = vadd.f32 %v680_v31, %v603_v25  ;;  %v720_v34 = vadd.f32 %v690_v32, %v607_v26 }
 0x138   : > { %739 = vst [vmem:[#allocation2 + $0x10] sm:$0xff] %v723_v29 }
 0x139   : > { %743 = vst [vmem:[#allocation2 + $0x78] sm:$0xff] %v727_v30 }
 0x13a   : > { %732 = vst [vmem:[#allocation2 + $0x18] sm:$0xff] %v716_v33 }
 0x13b   : > { %736 = vst [vmem:[#allocation2 + $0x48] sm:$0xff] %v720_v34 }
 0x13d   : > { %v700_v37 = vpop.f32.mrf.mxu2  ;;  %v710_v38 = vpop.f32.mrf.mxu3  ;;  %748 = sbr.rel (%p2732_p9) target bundleno = 1396 (0x574), region = 110 }
 0x13e   : > { %v724_v39 = vadd.f32 %v700_v37, %v611_v35  ;;  %v728_v40 = vadd.f32 %v710_v38, %v615_v36 }
 0x140   : > { %740 = vst [vmem:[#allocation2 + $0x38] sm:$0xff] %v724_v39 }
 0x141   : > { %744 = vst [vmem:[#allocation2 + $0x28] sm:$0xff] %v728_v40 }
 0x142   : > { %v3899_v41 = vld [vmem:[#allocation2 + $0x78] sm:$0xff]  ;;  %v3901_v42 = vld [vmem:[#allocation2 + $0x60] sm:$0xff]  ;;  %v3903_v43 = vld [vmem:[#allocation2 + $0x50] sm:$0xff]  ;;  %v3657_v44 = vmov 127  }
 0x143   : > { %3278 = vset.pattern.permute.xlu2 %v3657_v44  ;;  %3277 = vset.pattern.permute.xlu1 %v3657_v44  ;;  %v779_v45 = vmax.f32 %v3899_v41, 1.0  ;;  %v777_v46 = vmax.f32 %v3901_v42, 1.0  ;;  %v769_v47 = vmax.f32 %v3903_v43, 1.0  ;;  %v3910_v49 = vld [vmem:[#allocation2 + $0x70] sm:$0xff]  ;;  %v3912_v50 = vld [vmem:[#allocation2 + $0x68] sm:$0xff]  ;;  %v3926_v60 = vld [vmem:[#allocation2] sm:$0xff] }
 0x144   : > { %3276 = vset.pattern.permute.xlu0 %v3657_v44  ;;  %v778_v52 = vmax.f32 %v3910_v49, 1.0  ;;  %v770_v53 = vmax.f32 %v3912_v50, 1.0  ;;  %v3917_v54 = vld [vmem:[#allocation2 + $0x8] sm:$0xff]  ;;  %v3919_v55 = vld [vmem:[#allocation2 + $0x30] sm:$0xff]  ;;  %v3928_v61 = vld [vmem:[#allocation2 + $0x18] sm:$0xff]  ;;  %v766_v63 = vmax.f32 %v3926_v60, 1.0 }
 0x145   : > { %853 = vperm.xlu2 %3278, %v779_v45   ;;  %843 = vperm.xlu0 %3276, %v777_v46   ;;  %v3921_v56 = vld [vmem:[#allocation2 + $0x48] sm:$0xff]  ;;  %v771_v57 = vmax.f32 %v3917_v54, 1.0  ;;  %v765_v58 = vmax.f32 %v3919_v55, 1.0  ;;  %v3930_v62 = vld [vmem:[#allocation2 + $0x58] sm:$0xff]  ;;  %v768_v0 = vmax.f32 %v3928_v61, 1.0  ;;  %v3935_v2 = vld [vmem:[#allocation2 + $0x40] sm:$0xff] }
 0x146   : > { %803 = vperm.xlu1 %3277, %v769_v47   ;;  %v772_v59 = vmax.f32 %v3921_v56, 1.0  ;;  %v767_v1 = vmax.f32 %v3930_v62, 1.0  ;;  %v3937_v3 = vld [vmem:[#allocation2 + $0x10] sm:$0xff]  ;;  %v3939_v4 = vld [vmem:[#allocation2 + $0x20] sm:$0xff]  ;;  %v773_v5 = vmax.f32 %v3935_v2, 1.0 }
 0x147   : > { %v775_v6 = vmax.f32 %v3937_v3, 1.0  ;;  %v774_v7 = vmax.f32 %v3939_v4, 1.0  ;;  %v3944_v8 = vld [vmem:[#allocation2 + $0x38] sm:$0xff]  ;;  %v2793_v10 = vld [vmem:[#allocation9 + $0x70] sm:$0xf] }
 0x148   : > { %v3908_v48 = vld [vmem:[#allocation2 + $0x28] sm:$0xff]  ;;  %v776_v9 = vmax.f32 %v3944_v8, 1.0  ;;  %v2985_v11 = vld [vmem:[#allocation9 + $0x74] sm:$0xf0]  ;;  %v2785_v13 = vld [vmem:[#allocation9 + $0x60] sm:$0xf] }
 0x149   : > { %v780_v51 = vmax.f32 %v3908_v48, 1.0  ;;  %v2794_v12 = vor.u32 %v2985_v11, %v2793_v10  ;;  %v2983_v14 = vld [vmem:[#allocation9 + $0x64] sm:$0xf0]  ;;  %v2777_v16 = vld [vmem:[#allocation9 + $0x50] sm:$0xf] }
 0x14a   : > { %v2786_v15 = vor.u32 %v2983_v14, %v2785_v13  ;;  %v2981_v17 = vld [vmem:[#allocation9 + $0x54] sm:$0xf0]  ;;  %v2769_v20 = vld [vmem:[#allocation9 + $0x40] sm:$0xf]  ;;  %v2979_v21 = vld [vmem:[#allocation9 + $0x44] sm:$0xf0] }
 0x14b   : > { %3114 = vmatpush.bf16.msra.mxu1 %v2794_v12  ;;  %3116 = vmatpush.bf16.msra.mxu3 %v2794_v12  ;;  %v2778_v18 = vor.u32 %v2981_v17, %v2777_v16  ;;  %v2770_v22 = vor.u32 %v2979_v21, %v2769_v20  ;;  %v2761_v23 = vld [vmem:[#allocation9 + $0x30] sm:$0xf]  ;;  %v2977_v24 = vld [vmem:[#allocation9 + $0x34] sm:$0xf0]  ;;  %v2753_v28 = vld [vmem:[#allocation9 + $0x20] sm:$0xf] }
 0x14c   : > { %1242 = vmatpush.bf16.msra.mxu0 %v2794_v12  ;;  %3115 = vmatpush.bf16.msra.mxu2 %v2794_v12  ;;  %v2762_v25 = vor.u32 %v2977_v24, %v2761_v23  ;;  %v2975_v29 = vld [vmem:[#allocation9 + $0x24] sm:$0xf0]  ;;  %v2745_v32 = vld [vmem:[#allocation9 + $0x10] sm:$0xf]  ;;  %v2973_v33 = vld [vmem:[#allocation9 + $0x14] sm:$0xf0] }
 0x14d   : > { %858 = vperm.xlu2 %3278, %v780_v51   ;;  %848 = vperm.xlu0 %3276, %v778_v52   ;;  %v2754_v30 = vor.u32 %v2975_v29, %v2753_v28  ;;  %v2746_v35 = vor.u32 %v2973_v33, %v2745_v32  ;;  %v2737_v39 = vld [vmem:[#allocation9] sm:$0xf]  ;;  %v2971_v40 = vld [vmem:[#allocation9 + $0x4] sm:$0xf0]  ;;  %v2883_v16 = vld [vmem:[#allocation7 + $0x68] sm:$0xf0] }
 0x14e   : > { %808 = vperm.xlu1 %3277, %v770_v53   ;;  %v2738_v44 = vor.u32 %v2971_v40, %v2737_v39  ;;  %v2982_v21 = vld [vmem:[#allocation9 + $0x64] sm:$0xf] }
 0x14f   : > { %3117 = vmatpush.bf16.msra.mxu1 %v2786_v15  ;;  %3119 = vmatpush.bf16.msra.mxu3 %v2786_v15 }
 0x150   : > { %1243 = vmatpush.bf16.msra.mxu0 %v2786_v15  ;;  %3118 = vmatpush.bf16.msra.mxu2 %v2786_v15  ;;  %v2966_v15 = vld [vmem:[#allocation7 + $0x64] sm:$0xf] }
 0x153   : > { %3120 = vmatpush.bf16.msra.mxu1 %v2778_v18  ;;  %3122 = vmatpush.bf16.msra.mxu3 %v2778_v18 }
 0x154   : > { %1244 = vmatpush.bf16.msra.mxu0 %v2778_v18  ;;  %3121 = vmatpush.bf16.msra.mxu2 %v2778_v18 }
 0x155   : > { %813 = vperm.xlu0 %3276, %v771_v57   ;;  %783 = vperm.xlu2 %3278, %v765_v58  }
 0x156   : > { %818 = vperm.xlu1 %3277, %v772_v59  }
 0x157   : > { %3123 = vmatpush.bf16.msra.mxu1 %v2770_v22  ;;  %3125 = vmatpush.bf16.msra.mxu3 %v2770_v22 }
 0x158   : > { %1245 = vmatpush.bf16.msra.mxu0 %v2770_v22  ;;  %3124 = vmatpush.bf16.msra.mxu2 %v2770_v22  ;;  %v2787_v22 = vld [vmem:[#allocation9 + $0x68] sm:$0xf0] }
 0x159   : > { %v2790_v29 = vor.u32 %v2982_v21, %v2787_v22 }
 0x15b   : > { %3126 = vmatpush.bf16.msra.mxu1 %v2762_v25  ;;  %3128 = vmatpush.bf16.msra.mxu3 %v2762_v25 }
 0x15c   : > { %1246 = vmatpush.bf16.msra.mxu0 %v2762_v25  ;;  %3127 = vmatpush.bf16.msra.mxu2 %v2762_v25  ;;  %v2886_v25 = vor.u32 %v2966_v15, %v2883_v16  ;;  %v2962_v15 = vld [vmem:[#allocation7 + $0x44] sm:$0xf]  ;;  %v2867_v16 = vld [vmem:[#allocation7 + $0x48] sm:$0xf0] }
 0x15d   : > { %788 = vperm.xlu0 %3276, %v766_v63   ;;  %798 = vperm.xlu2 %3278, %v768_v0   ;;  %v2968_v0 = vld [vmem:[#allocation7 + $0x74] sm:$0xf] }
 0x15e   : > { %793 = vperm.xlu1 %3277, %v767_v1   ;;  %v2891_v1 = vld [vmem:[#allocation7 + $0x78] sm:$0xf0] }
 0x15f   : > { %3129 = vmatpush.bf16.msra.mxu1 %v2754_v30  ;;  %3131 = vmatpush.bf16.msra.mxu3 %v2754_v30  ;;  %v2894_v14 = vor.u32 %v2968_v0, %v2891_v1  ;;  %v2964_v1 = vld [vmem:[#allocation7 + $0x54] sm:$0xf] }
 0x160   : > { %1247 = vmatpush.bf16.msra.mxu0 %v2754_v30  ;;  %3130 = vmatpush.bf16.msra.mxu2 %v2754_v30 }
 0x163   : > { %3132 = vmatpush.bf16.msra.mxu1 %v2746_v35  ;;  %3134 = vmatpush.bf16.msra.mxu3 %v2746_v35 }
 0x164   : > { %1248 = vmatpush.bf16.msra.mxu0 %v2746_v35  ;;  %3133 = vmatpush.bf16.msra.mxu2 %v2746_v35 }
 0x165   : > { %823 = vperm.xlu0 %3276, %v773_v5   ;;  %833 = vperm.xlu2 %3278, %v775_v6   ;;  %v2875_v5 = vld [vmem:[#allocation7 + $0x58] sm:$0xf0] }
 0x166   : > { %828 = vperm.xlu1 %3277, %v774_v7   ;;  %v2984_v7 = vld [vmem:[#allocation9 + $0x74] sm:$0xf] }
 0x167   : > { %3135 = vmatpush.bf16.msra.mxu1 %v2738_v44  ;;  %3137 = vmatpush.bf16.msra.mxu3 %v2738_v44 }
 0x168   : > { %1249 = vmatpush.bf16.msra.mxu0 %v2738_v44  ;;  %3136 = vmatpush.bf16.msra.mxu2 %v2738_v44 }
 0x16b   : > { %1517 = vmatpush.bf16.msrb.mxu3 %v2894_v14 }
 0x16d   : > { %838 = vperm.xlu0 %3276, %v776_v9   ;;  %v2795_v9 = vld [vmem:[#allocation9 + $0x78] sm:$0xf0] }
 0x16e   : > { %v2798_v20 = vor.u32 %v2984_v7, %v2795_v9 }
 0x16f   : > { %1518 = vmatpush.bf16.msrb.mxu3 %v2886_v25 }
 0x170   : > { %1291 = vmatpush.bf16.msrb.mxu1 %v2798_v20 }
 0x174   : > { %1292 = vmatpush.bf16.msrb.mxu1 %v2790_v29 }
 0x19f   : > { %v3947_v19 = vpop.permute.xlu2 %853 }
 0x1a0   : > { %3283 = vrcp.f32 %v3947_v19  ;;  %vm1076_vm0 = vweird.f32 %v3947_v19  ;;  %v1082_v51 = vand.u32 2147483648, %v3947_v19  ;;  %v1080_v59 = vand.u32 2147483647, %v3947_v19 }
 0x1a2   : > { %v1083_v12 = vor.u32 1.1754944e-38, %v1082_v51  ;;  %vm3997_vm5 = vcmp.eq.f32.partialorder %v1080_v59, 8.507059e+37 }
 0x1a6   : > { %v3952_v27 = vpop.eup %3283 }
 0x1a7   : > { %v3950_v26 = vpop.permute.xlu2 %858  ;;  %v1072_v31 = vmul.f32 %v3952_v27, %v3947_v19  ;;  %vm1077_vm1 = vweird.f32 %v3952_v27 }
 0x1a8   : > { %3285 = vrcp.f32 %v3950_v26  ;;  %vm3982_vm2 = vmor %vm1076_vm0, %vm1077_vm1  ;;  %vm1091_vm3 = vweird.f32 %v3950_v26  ;;  %v1097_v10 = vand.u32 2147483648, %v3950_v26  ;;  %v1095_v13 = vand.u32 2147483647, %v3950_v26 }
 0x1a9   : > { %v1073_v36 = vsub.f32 1.0, %v1072_v31 }
 0x1aa   : > { %v1098_v31 = vor.u32 1.1754944e-38, %v1097_v10  ;;  %vm4029_vm8 = vcmp.eq.f32.partialorder %v1095_v13, 8.507059e+37  ;;  %v2980_v10 = vld [vmem:[#allocation9 + $0x54] sm:$0xf] }
 0x1ab   : > { %v1074_v45 = vmul.f32 %v3952_v27, %v1073_v36 }
 0x1ad   : > { %v1075_v58 = vadd.f32 %v3952_v27, %v1074_v45 }
 0x1ae   : > { %v3957_v34 = vpop.eup %3285 }
 0x1af   : > { %v1087_v37 = vmul.f32 %v3957_v34, %v3950_v26  ;;  %v3961_v38 = vpop.permute.xlu2 %783  ;;  %vm1092_vm4 = vweird.f32 %v3957_v34  ;;  %v1079_v17 = vsel %vm3982_vm2, %v3952_v27, %v1075_v58 }
 0x1b0   : > { %3287 = vrcp.f32 %v3961_v38  ;;  %v872_v11 = vand.u32 2147483648, %v3961_v38  ;;  %vm4007_vm6 = vmor %vm1091_vm3, %vm1092_vm4  ;;  %vm866_vm7 = vweird.f32 %v3961_v38  ;;  %v870_v27 = vand.u32 2147483647, %v3961_v38 }
 0x1b1   : > { %v1088_v46 = vsub.f32 1.0, %v1087_v37  ;;  %v1084_v26 = vsel %vm3997_vm5, %v1083_v12, %v1079_v17 }
 0x1b2   : > { %v4015_v30 = vor.u32 1.1754944e-38, %v872_v11  ;;  %v2779_v11 = vld [vmem:[#allocation9 + $0x58] sm:$0xf0]  ;;  %vm4090_vm0 = vcmp.eq.f32.partialorder %v870_v27, 8.507059e+37 }
 0x1b3   : > { %v1089_v52 = vmul.f32 %v3957_v34, %v1088_v46  ;;  %v2782_v29 = vor.u32 %v2980_v10, %v2779_v11 }
 0x1b5   : > { %v1090_v19 = vadd.f32 %v3957_v34, %v1089_v52  ;;  %1293 = vmatpush.bf16.msrb.mxu1 %v2782_v29 }
 0x1b6   : > { %v3967_v47 = vpop.eup %3287 }
 0x1b7   : > { %v3971_v53 = vpop.permute.xlu0 %843  ;;  %v3973_v57 = vpop.permute.xlu2 %798  ;;  %v862_v6 = vmul.f32 %v3967_v47, %v3961_v38  ;;  %v1094_v37 = vsel %vm4007_vm6, %v3957_v34, %v1090_v19  ;;  %vm867_vm9 = vweird.f32 %v3967_v47  ;;  %v2878_v19 = vor.u32 %v2964_v1, %v2875_v5 }
 0x1b8   : > { %3289 = vrcp.f32 %v3971_v53  ;;  %v3978_v63 = vpop.permute.xlu1 %803  ;;  %v1052_v35 = vand.u32 2147483648, %v3971_v53  ;;  %v1050_v58 = vand.u32 2147483647, %v3971_v53  ;;  %v1099_v7 = vsel %vm4029_vm8, %v1098_v31, %v1094_v37  ;;  %vm4086_vm15 = vmor %vm866_vm7, %vm867_vm9 }
 0x1b9   : > { %3291 = vrcp.f32 %v3978_v63  ;;  %v863_v24 = vsub.f32 1.0, %v862_v6  ;;  %v932_v44 = vand.u32 2147483648, %v3978_v63  ;;  %v930_v51 = vand.u32 2147483647, %v3978_v63  ;;  %1519 = vmatpush.bf16.msrb.mxu3 %v2878_v19 }
 0x1ba   : > { %3293 = vrcp.f32 %v3973_v57  ;;  %v4049_v6 = vmul.f32 %v1084_v26, %v3899_v41  ;;  %vm1046_vm10 = vweird.f32 %v3971_v53  ;;  %vm926_vm11 = vweird.f32 %v3978_v63  ;;  %v2859_v26 = vld [vmem:[#allocation7 + $0x38] sm:$0xf0] }
 0x1bb   : > { %v864_v52 = vmul.f32 %v3967_v47, %v863_v24  ;;  %v917_v9 = vand.u32 2147483648, %v3973_v57  ;;  %v933_v14 = vor.u32 1.1754944e-38, %v932_v44  ;;  %v4059_v41 = vor.u32 1.1754944e-38, %v1052_v35 }
 0x1bc   : > { %vm4063_vm12 = vcmp.eq.f32.partialorder %v930_v51, 8.507059e+37  ;;  %v4071_v21 = vmul.f32 %v1099_v7, %v3908_v48  ;;  %vm4078_vm14 = vcmp.eq.f32.partialorder %v1050_v58, 8.507059e+37  ;;  %v2870_v38 = vor.u32 %v2962_v15, %v2867_v16  ;;  %v2978_v58 = vld [vmem:[#allocation9 + $0x44] sm:$0xf] }
 0x1bd   : > { %v4068_v20 = vadd.f32 %v3967_v47, %v864_v52 }
 0x1be   : > { %v4013_v28 = vpop.eup %3289  ;;  %1520 = vmatpush.bf16.msrb.mxu3 %v2870_v38 }
 0x1bf   : > { %v4019_v32 = vpop.eup %3291  ;;  %v1042_v33 = vmul.f32 %v4013_v28, %v3971_v53  ;;  %v4024_v36 = vpop.permute.xlu0 %848  ;;  %vm1047_vm13 = vweird.f32 %v4013_v28  ;;  %v869_v1 = vsel %vm4086_vm15, %v3967_v47, %v4068_v20 }
 0x1c0   : > { %v922_v40 = vmul.f32 %v4019_v32, %v3978_v63  ;;  %3295 = vrcp.f32 %v4024_v36  ;;  %v4037_v45 = vpop.permute.xlu1 %808  ;;  %v4039_v46 = vpop.permute.xlu2 %833  ;;  %v1067_v23 = vand.u32 2147483648, %v4024_v36  ;;  %vm927_vm1 = vweird.f32 %v4019_v32  ;;  %vm4135_vm5 = vmor %vm1046_vm10, %vm1047_vm13 }
 0x1c1   : > { %v1043_v34 = vsub.f32 1.0, %v1042_v33  ;;  %3297 = vrcp.f32 %v4037_v45  ;;  %v4045_v59 = vpop.eup %3293  ;;  %v947_v24 = vand.u32 2147483648, %v4037_v45  ;;  %vm1061_vm2 = vweird.f32 %v4024_v36  ;;  %vm4122_vm4 = vmor %vm926_vm11, %vm927_vm1 }
 0x1c2   : > { %v923_v0 = vsub.f32 1.0, %v922_v40  ;;  %3299 = vrcp.f32 %v4039_v46  ;;  %v907_v17 = vmul.f32 %v4045_v59, %v3973_v57  ;;  %v945_v40 = vand.u32 2147483647, %v4037_v45 }
 0x1c3   : > { %v1044_v12 = vmul.f32 %v4013_v28, %v1043_v34  ;;  %vm941_vm3 = vweird.f32 %v4037_v45  ;;  %v1065_v10 = vand.u32 2147483647, %v4024_v36  ;;  %v1068_v20 = vor.u32 1.1754944e-38, %v1067_v23 }
 0x1c4   : > { %v924_v13 = vmul.f32 %v4019_v32, %v923_v0  ;;  %v908_v52 = vsub.f32 1.0, %v907_v17  ;;  %v2771_v0 = vld [vmem:[#allocation9 + $0x48] sm:$0xf0]  ;;  %vm4151_vm7 = vcmp.eq.f32.partialorder %v945_v40, 8.507059e+37  ;;  %v2958_v17 = vld [vmem:[#allocation7 + $0x24] sm:$0xf] }
 0x1c5   : > { %v1045_v44 = vadd.f32 %v4013_v28, %v1044_v12  ;;  %v948_v12 = vor.u32 1.1754944e-38, %v947_v24  ;;  %v2774_v16 = vor.u32 %v2978_v58, %v2771_v0  ;;  %vm4168_vm10 = vcmp.eq.f32.partialorder %v1065_v10, 8.507059e+37 }
 0x1c6   : > { %v4073_v22 = vpop.eup %3295  ;;  %v925_v37 = vadd.f32 %v4019_v32, %v924_v13  ;;  %v4149_v53 = vmul.f32 %v4045_v59, %v908_v52  ;;  %v2763_v13 = vld [vmem:[#allocation9 + $0x38] sm:$0xf0] }
 0x1c7   : > { %v4094_v31 = vpop.eup %3297  ;;  %v1057_v33 = vmul.f32 %v4073_v22, %v4024_v36  ;;  %v4098_v35 = vpop.permute.xlu0 %813  ;;  %vm1062_vm6 = vweird.f32 %v4073_v22  ;;  %1294 = vmatpush.bf16.msrb.mxu1 %v2774_v16 }
 0x1c8   : > { %v937_v39 = vmul.f32 %v4094_v31, %v4037_v45  ;;  %3301 = vrcp.f32 %v4098_v35  ;;  %v4105_v27 = vpop.permute.xlu1 %818  ;;  %v4109_v51 = vpop.eup %3299  ;;  %v929_v47 = vsel %vm4122_vm4, %v4019_v32, %v925_v37  ;;  %v1049_v32 = vsel %vm4135_vm5, %v4013_v28, %v1045_v44  ;;  %vm4164_vm9 = vmor %vm1061_vm2, %vm1062_vm6 }
 0x1c9   : > { %v1058_v34 = vsub.f32 1.0, %v1057_v33  ;;  %3303 = vrcp.f32 %v4105_v27  ;;  %v4143_v15 = vmul.f32 %v4109_v51, %v4039_v46  ;;  %v934_v29 = vsel %vm4063_vm12, %v933_v14, %v929_v47  ;;  %v2976_v47 = vld [vmem:[#allocation9 + $0x34] sm:$0xf] }
 0x1ca   : > { %v938_v5 = vsub.f32 1.0, %v937_v39  ;;  %vm942_vm8 = vweird.f32 %v4094_v31  ;;  %vm956_vm11 = vweird.f32 %v4098_v35  ;;  %v962_v18 = vand.u32 2147483648, %v4098_v35 }
 0x1cb   : > { %v1059_v11 = vmul.f32 %v4073_v22, %v1058_v34  ;;  %v1054_v36 = vsel %vm4078_vm14, %v4059_v41, %v1049_v32  ;;  %v1013_v39 = vsub.f32 1.0, %v4143_v15  ;;  %vm971_vm12 = vweird.f32 %v4105_v27  ;;  %vm943_vm13 = vmor %vm941_vm3, %vm942_vm8 }
 0x1cc   : > { %v939_v63 = vmul.f32 %v4094_v31, %v938_v5  ;;  %v977_v44 = vand.u32 2147483648, %v4105_v27  ;;  %v935_v41 = vmul.f32 %v934_v29, %v3903_v43  ;;  %v1055_v0 = vmul.f32 %v1054_v36, %v3901_v42 }
 0x1cd   : > { %v1060_v19 = vadd.f32 %v4073_v22, %v1059_v11  ;;  %v960_v10 = vand.u32 2147483647, %v4098_v35  ;;  %v2960_v11 = vld [vmem:[#allocation7 + $0x34] sm:$0xf]  ;;  %v975_v28 = vand.u32 2147483647, %v4105_v27  ;;  %v2766_v33 = vor.u32 %v2976_v47, %v2763_v13 }
 0x1ce   : > { %v4156_v24 = vpop.eup %3301  ;;  %v940_v48 = vadd.f32 %v4094_v31, %v939_v63  ;;  %v2889_v47 = vld [vmem:[#allocation7 + $0x70] sm:$0xf]  ;;  %v2969_v13 = vld [vmem:[#allocation7 + $0x74] sm:$0xf0]  ;;  %vm911_vm8 = vweird.f32 %v3973_v57 }
 0x1cf   : > { %v4172_v23 = vpop.eup %3303  ;;  %v952_v14 = vmul.f32 %v4156_v24, %v4098_v35  ;;  %v4178_v37 = vpop.permute.xlu0 %788  ;;  %v1064_v38 = vsel %vm4164_vm9, %v4073_v22, %v1060_v19  ;;  %v874_v22 = vsel %vm4090_vm0, %v4015_v30, %v869_v1  ;;  %v963_v1 = vor.u32 1.1754944e-38, %v962_v18  ;;  %1295 = vmatpush.bf16.msrb.mxu1 %v2766_v33  ;;  %v2970_v33 = vld [vmem:[#allocation9 + $0x4] sm:$0xf] }
 0x1d0   : > { %v967_v40 = vmul.f32 %v4172_v23, %v4105_v27  ;;  %v4191_v52 = vpop.permute.xlu1 %793  ;;  %3305 = vrcp.f32 %v4178_v37  ;;  %v944_v58 = vsel %vm943_vm13, %v4094_v31, %v940_v48  ;;  %v1069_v5 = vsel %vm4168_vm10, %v1068_v20, %v1064_v38 }
 0x1d1   : > { %v953_v34 = vsub.f32 1.0, %v952_v14  ;;  %3307 = vrcp.f32 %v4191_v52  ;;  %v949_v43 = vsel %vm4151_vm7, %v948_v12, %v944_v58  ;;  %v1070_v45 = vmul.f32 %v1069_v5, %v3910_v49  ;;  %v2851_v14 = vld [vmem:[#allocation7 + $0x28] sm:$0xf0]  ;;  %v2843_v5 = vld [vmem:[#allocation7 + $0x18] sm:$0xf0] }
 0x1d2   : > { %v968_v25 = vsub.f32 1.0, %v967_v40  ;;  %v950_v31 = vmul.f32 %v949_v43, %v3912_v50  ;;  %v4215_v42 = vmul.f32 %v874_v22, %v3919_v55  ;;  %v887_v63 = vand.u32 2147483648, %v4178_v37 }
 0x1d3   : > { %v954_v7 = vmul.f32 %v4156_v24, %v953_v34  ;;  %v4218_v32 = vpack.c.bf16 %v1070_v45, %v1055_v0  ;;  %vm957_vm14 = vweird.f32 %v4156_v24  ;;  %vm972_vm15 = vweird.f32 %v4172_v23  ;;  %v2974_v34 = vld [vmem:[#allocation9 + $0x24] sm:$0xf]  ;;  %v2956_v0 = vld [vmem:[#allocation7 + $0x14] sm:$0xf] }
 0x1d4   : > { %v969_v30 = vmul.f32 %v4172_v23, %v968_v25  ;;  %v4224_v16 = vpack.c.bf16 %v950_v31, %v935_v41  ;;  %v2862_v55 = vor.u32 %v2960_v11, %v2859_v26  ;;  %vm4235_vm0 = vcmp.eq.f32.partialorder %v960_v10, 8.507059e+37  ;;  %vm4252_vm2 = vmor %vm956_vm11, %vm957_vm14  ;;  %v2755_v41 = vld [vmem:[#allocation9 + $0x28] sm:$0xf0]  ;;  %v2972_v10 = vld [vmem:[#allocation9 + $0x14] sm:$0xf] }
 0x1d5   : > { %v955_v49 = vadd.f32 %v4156_v24, %v954_v7  ;;  %1280 = vmatmul.bf16.vlgmr.msra.gmra.mxu3 %v4218_v32  ;;  %vm881_vm1 = vweird.f32 %v4178_v37  ;;  %v885_v38 = vand.u32 2147483647, %v4178_v37  ;;  %v902_v22 = vand.u32 2147483648, %v4191_v52  ;;  %vm4265_vm3 = vmor %vm971_vm12, %vm972_vm15  ;;  %v2747_v11 = vld [vmem:[#allocation9 + $0x18] sm:$0xf0] }
 0x1d6   : > { %v4222_v12 = vpop.eup %3305  ;;  %v970_v50 = vadd.f32 %v4172_v23, %v969_v30  ;;  %1260 = vmatmul.bf16.vlgmr.msra.gmra.mxu1 %v4224_v16  ;;  %1521 = vmatpush.bf16.msrb.mxu3 %v2862_v55  ;;  %v888_v7 = vor.u32 1.1754944e-38, %v887_v63  ;;  %v978_v45 = vor.u32 1.1754944e-38, %v977_v44  ;;  %v2758_v31 = vor.u32 %v2974_v34, %v2755_v41  ;;  %v2954_v55 = vld [vmem:[#allocation7 + $0x4] sm:$0xf]  ;;  %v2739_v41 = vld [vmem:[#allocation9 + $0x8] sm:$0xf0] }
 0x1d7   : > { %v4228_v19 = vpop.eup %3307  ;;  %v877_v20 = vmul.f32 %v4222_v12, %v4178_v37  ;;  %v4233_v29 = vpop.permute.xlu0 %823  ;;  %v959_v58 = vsel %vm4252_vm2, %v4156_v24, %v955_v49  ;;  %v2854_v24 = vor.u32 %v2958_v17, %v2851_v14  ;;  %vm882_vm4 = vweird.f32 %v4222_v12  ;;  %v2957_v63 = vld [vmem:[#allocation7 + $0x14] sm:$0xf0] }
 0x1d8   : > { %v892_v18 = vmul.f32 %v4228_v19, %v4191_v52  ;;  %v4244_v36 = vpop.permute.xlu1 %828  ;;  %3309 = vrcp.f32 %v4233_v29  ;;  %v974_v43 = vsel %vm4265_vm3, %v4172_v23, %v970_v50  ;;  %vm4276_vm5 = vcmp.eq.f32.partialorder %v885_v38, 8.507059e+37  ;;  %1296 = vmatpush.bf16.msrb.mxu1 %v2758_v31  ;;  %vm4297_vm9 = vmor %vm881_vm1, %vm882_vm4 }
 0x1d9   : > { %v878_v25 = vsub.f32 1.0, %v877_v20  ;;  %3311 = vrcp.f32 %v4244_v36  ;;  %v964_v23 = vsel %vm4235_vm0, %v963_v1, %v959_v58  ;;  %vm976_vm6 = vcmp.eq.f32.partialorder %v975_v28, 8.507059e+37  ;;  %v2835_v28 = vld [vmem:[#allocation7 + $0x8] sm:$0xf0]  ;;  %v2967_v58 = vld [vmem:[#allocation7 + $0x64] sm:$0xf0] }
 0x1da   : > { %v893_v26 = vsub.f32 1.0, %v892_v18  ;;  %v4284_v27 = vpack.c.bf16 %v4071_v21, %v4049_v6  ;;  %1522 = vmatpush.bf16.msrb.mxu3 %v2854_v24  ;;  %vm986_vm7 = vweird.f32 %v4233_v29  ;;  %v979_v49 = vsel %vm976_vm6, %v978_v45, %v974_v43 }
 0x1db   : > { %v879_v30 = vmul.f32 %v4222_v12, %v878_v25  ;;  %v2846_v50 = vor.u32 %v2956_v0, %v2843_v5  ;;  %v1007_v1 = vand.u32 2147483648, %v4244_v36  ;;  %v992_v20 = vand.u32 2147483648, %v4233_v29  ;;  %v2881_v25 = vld [vmem:[#allocation7 + $0x60] sm:$0xf] }
 0x1dc   : > { %v2750_v21 = vor.u32 %v2972_v10, %v2747_v11  ;;  %v2890_v48 = vor.u32 %v2969_v13, %v2889_v47  ;;  %v894_v18 = vmul.f32 %v4228_v19, %v893_v26  ;;  %vm896_vm10 = vweird.f32 %v4191_v52 }
 0x1dd   : > { %v880_v44 = vadd.f32 %v4222_v12, %v879_v30  ;;  %v965_v34 = vmul.f32 %v964_v23, %v3917_v54  ;;  %v980_v0 = vmul.f32 %v979_v49, %v3921_v56  ;;  %v990_v5 = vand.u32 2147483647, %v4233_v29  ;;  %v2873_v23 = vld [vmem:[#allocation7 + $0x50] sm:$0xf] }
 0x1de   : > { %v4288_v17 = vpop.eup %3309  ;;  %1523 = vmatpush.bf16.msrb.mxu3 %v2846_v50  ;;  %1468 = vmatpush.bf16.msrb.mxu2 %v2890_v48  ;;  %v1005_v54 = vand.u32 2147483647, %v4244_v36  ;;  %v2838_v45 = vor.u32 %v2954_v55, %v2835_v28  ;;  %v2742_v11 = vor.u32 %v2970_v33, %v2739_v41  ;;  %v2882_v26 = vor.u32 %v2967_v58, %v2881_v25  ;;  %v2963_v33 = vld [vmem:[#allocation7 + $0x44] sm:$0xf0] }
 0x1df   : > { %v4301_v14 = vpop.eup %3311  ;;  %v982_v38 = vmul.f32 %v4288_v17, %v4233_v29  ;;  %v4307_v40 = vpop.permute.xlu0 %838  ;;  %v884_v37 = vsel %vm4297_vm9, %v4222_v12, %v880_v44  ;;  %1297 = vmatpush.bf16.msrb.mxu1 %v2750_v21  ;;  %vm1001_vm11 = vweird.f32 %v4244_v36  ;;  %vm987_vm12 = vweird.f32 %v4288_v17 }
 0x1e0   : > { %v997_v35 = vmul.f32 %v4301_v14, %v4244_v36  ;;  %3313 = vrcp.f32 %v4307_v40  ;;  %v889_v12 = vsel %vm4276_vm5, %v888_v7, %v884_v37  ;;  %v993_v30 = vor.u32 1.1754944e-38, %v992_v20  ;;  %vm988_vm0 = vmor %vm986_vm7, %vm987_vm12  ;;  %v2953_v36 = vld [vmem:[%s4415_s10 + $0x38] sm:$0xff] }
 0x1e1   : > { %v983_v43 = vsub.f32 1.0, %v982_v38  ;;  %v890_v10 = vmul.f32 %v889_v12, %v3926_v60  ;;  %vm1002_vm13 = vweird.f32 %v4301_v14  ;;  %v1008_v47 = vor.u32 1.1754944e-38, %v1007_v1 }
 0x1e2   : > { %v998_v24 = vsub.f32 1.0, %v997_v35  ;;  %1524 = vmatpush.bf16.msrb.mxu3 %v2838_v45  ;;  %1469 = vmatpush.bf16.msrb.mxu2 %v2882_v26  ;;  %v4330_v60 = vpack.c.bf16 %v980_v0, %v965_v34  ;;  %vm4333_vm14 = vcmp.eq.f32.partialorder %v990_v5, 8.507059e+37  ;;  %vm897_vm15 = vweird.f32 %v4228_v19  ;;  %vm1003_vm3 = vmor %vm1001_vm11, %vm1002_vm13  ;;  %v2959_v45 = vld [vmem:[#allocation7 + $0x24] sm:$0xf0] }
 0x1e3   : > { %v984_v56 = vmul.f32 %v4288_v17, %v983_v43  ;;  %v4327_v7 = vpack.c.bf16 %v890_v10, %v4215_v42  ;;  %1298 = vmatpush.bf16.msrb.mxu1 %v2742_v11  ;;  %v2965_v42 = vld [vmem:[#allocation7 + $0x54] sm:$0xf0]  ;;  %vm4346_vm1 = vcmp.eq.f32.partialorder %v1005_v54, 8.507059e+37  ;;  %v895_v55 = vadd.f32 %v4228_v19, %v894_v18  ;;  %vm4372_vm4 = vmor %vm896_vm10, %vm897_vm15  ;;  %v2849_v54 = vld [vmem:[#allocation7 + $0x20] sm:$0xf] }
 0x1e4   : > { %v999_v31 = vmul.f32 %v4301_v14, %v998_v24  ;;  %vm912_vm2 = vweird.f32 %v4045_v59  ;;  %v900_v29 = vand.u32 2147483647, %v4191_v52  ;;  %v910_v6 = vadd.f32 %v4045_v59, %v4149_v53  ;;  %v2865_v53 = vld [vmem:[#allocation7 + $0x40] sm:$0xf] }
 0x1e5   : > { %v985_v13 = vadd.f32 %v4288_v17, %v984_v56  ;;  %1250 = vmatmul.bf16.vlgmr.msra.gmra.mxu0 %v4327_v7  ;;  %1285 = vmatmul.bf16.gmra.mxu3 %v4284_v27  ;;  %v2874_v28 = vor.u32 %v2965_v42, %v2873_v23  ;;  %vm4384_vm5 = vmor %vm911_vm8, %vm912_vm2  ;;  %v1014_v34 = vmul.f32 %v4109_v51, %v1013_v39  ;;  %v903_v58 = vor.u32 1.1754944e-38, %v902_v22  ;;  %v2857_v39 = vld [vmem:[#allocation7 + $0x30] sm:$0xf]  ;;  %v2946_v56 = vld [vmem:[%s4415_s10] sm:$0xff] }
 0x1e6   : > { %v4338_v44 = vpop.eup %3313  ;;  %v1000_v49 = vadd.f32 %v4301_v14, %v999_v31  ;;  %1265 = vmatmul.bf16.gmra.mxu1 %v4330_v60  ;;  %v918_v35 = vor.u32 1.1754944e-38, %v917_v9  ;;  %v2866_v0 = vor.u32 %v2963_v33, %v2865_v53  ;;  %vm901_vm6 = vcmp.eq.f32.partialorder %v900_v29, 8.507059e+37  ;;  %v2948_v29 = vld [vmem:[%s4415_s10 + $0x10] sm:$0xff] }
 0x1e7   : > { %v1027_v1 = vmul.f32 %v4338_v44, %v4307_v40  ;;  %v989_v20 = vsel %vm988_vm0, %v4288_v17, %v985_v13  ;;  %v915_v17 = vand.u32 2147483647, %v3973_v57  ;;  %1470 = vmatpush.bf16.msrb.mxu2 %v2874_v28  ;;  %vm1016_vm8 = vweird.f32 %v4039_v46  ;;  %v2841_v13 = vld [vmem:[#allocation7 + $0x10] sm:$0xf] }
 0x1e8   : > { %v994_v21 = vsel %vm4333_vm14, %v993_v30, %v989_v20  ;;  %v1004_v48 = vsel %vm1003_vm3, %v4301_v14, %v1000_v49  ;;  %vm1032_vm9 = vweird.f32 %v4338_v44  ;;  %vm1031_vm10 = vweird.f32 %v4307_v40  ;;  %v2833_v49 = vld [vmem:[#allocation7] sm:$0xf]  ;;  %v2947_v20 = vld [vmem:[%s4415_s10 + $0x8] sm:$0xff] }
 0x1e9   : > { %v1028_v18 = vsub.f32 1.0, %v1027_v1  ;;  %v995_v38 = vmul.f32 %v994_v21, %v3935_v2  ;;  %v1009_v37 = vsel %vm4346_vm1, %v1008_v47, %v1004_v48  ;;  %v899_v2 = vsel %vm4372_vm4, %v4228_v19, %v895_v55  ;;  %v2961_v19 = vld [vmem:[#allocation7 + $0x34] sm:$0xf0]  ;;  %vm4421_vm12 = vmor %vm1031_vm10, %vm1032_vm9 }
 0x1ea   : > { %v1010_v41 = vmul.f32 %v1009_v37, %v3939_v4  ;;  %v914_v4 = vsel %vm4384_vm5, %v4045_v59, %v910_v6  ;;  %vm916_vm7 = vcmp.eq.f32.partialorder %v915_v17, 8.507059e+37  ;;  %v904_v5 = vsel %vm901_vm6, %v903_v58, %v899_v2  ;;  %v2952_v6 = vld [vmem:[%s4415_s10 + $0x30] sm:$0xff] }
 0x1eb   : > { %v1029_v25 = vmul.f32 %v4338_v44, %v1028_v18  ;;  %v1037_v9 = vand.u32 2147483648, %v4307_v40  ;;  %v919_v52 = vsel %vm916_vm7, %v918_v35, %v914_v4  ;;  %1471 = vmatpush.bf16.msrb.mxu2 %v2866_v0  ;;  %v2858_v59 = vor.u32 %v2961_v19, %v2857_v39 }
 0x1ec   : > { %v4400_v15 = vpack.c.bf16 %v1010_v41, %v995_v38  ;;  %v905_v22 = vmul.f32 %v904_v5, %v3930_v62  ;;  %v1015_v43 = vadd.f32 %v4109_v51, %v1014_v34  ;;  %vm1017_vm11 = vweird.f32 %v4109_v51  ;;  %v1566_v38 = vld [vmem:[%s4999_s11] sm:$0x3] }
 0x1ed   : > { %v1030_v57 = vadd.f32 %v4338_v44, %v1029_v25  ;;  %v1035_v12 = vand.u32 2147483647, %v4307_v40  ;;  %v1022_v24 = vand.u32 2147483648, %v4039_v46  ;;  %v920_v62 = vmul.f32 %v919_v52, %v3928_v61  ;;  %vm1018_vm13 = vmor %vm1016_vm8, %vm1017_vm11 }
 0x1ee   : > { %1270 = vmatmul.bf16.vlgmr.msra.gmra.mxu2 %v4400_v15  ;;  %v1020_v11 = vand.u32 2147483647, %v4039_v46  ;;  %v1038_v40 = vor.u32 1.1754944e-38, %v1037_v9  ;;  %v2850_v30 = vor.u32 %v2959_v45, %v2849_v54  ;;  %v1019_v47 = vsel %vm1018_vm13, %v4109_v51, %v1015_v43  ;;  %v2955_v51 = vld [vmem:[#allocation7 + $0x4] sm:$0xf0] }
 0x1ef   : > { %v1034_v26 = vsel %vm4421_vm12, %v4338_v44, %v1030_v57  ;;  %1472 = vmatpush.bf16.msrb.mxu2 %v2858_v59  ;;  %v1102_v31 = vpack.c.bf16 %v920_v62, %v905_v22  ;;  %vm1036_vm14 = vcmp.eq.f32.partialorder %v1035_v12, 8.507059e+37  ;;  %v1023_v61 = vor.u32 1.1754944e-38, %v1022_v24 }
 0x1f0   : > { %v1039_v23 = vsel %vm1036_vm14, %v1038_v40, %v1034_v26  ;;  %vm1021_vm15 = vcmp.eq.f32.partialorder %v1020_v11, 8.507059e+37  ;;  %v2842_v46 = vor.u32 %v2957_v63, %v2841_v13  ;;  %v2834_v55 = vor.u32 %v2955_v51, %v2833_v49 }
 0x1f1   : > { %v1024_v42 = vsel %vm1021_vm15, %v1023_v61, %v1019_v47  ;;  %v1040_v44 = vmul.f32 %v1039_v23, %v3944_v8  ;;  %v2949_v8 = vld [vmem:[%s4415_s10 + $0x18] sm:$0xff]  ;;  %v1636_v37 = vlaneseq  ;;  %v4472_v34 = vperm.slane %v1566_v38, 1 }
 0x1f2   : > { %v1025_v50 = vmul.f32 %v1024_v42, %v3937_v3  ;;  %v2950_v3 = vld [vmem:[%s4415_s10 + $0x20] sm:$0xff] }
 0x1f3   : > { %1473 = vmatpush.bf16.msrb.mxu2 %v2850_v30  ;;  %v4474_v41 = vand.u32 127, %v1636_v37 }
 0x1f4   : > { %v1106_v1 = vpack.c.bf16 %v1040_v44, %v1025_v50 }
 0x1f5   : > { %1255 = vmatmul.bf16.gmra.mxu0 %v1102_v31  ;;  %1525 = vmatmul.bf16.vlgmr.msrb.gmra.mxu3 %v2946_v56  ;;  %vm1638_vm0 = vcmp.lt.s32.totalorder %v4474_v41, 4  ;;  %v2988_v41 = vld [vmem:[#allocation4 + $0x10] sm:$0xff] }
 0x1f6   : > { %1299 = vmatmul.bf16.vlgmr.msrb.gmra.mxu1 %v4327_v7  ;;  %v2951_v7 = vld [vmem:[%s4415_s10 + $0x28] sm:$0xff] }
 0x1f7   : > { %1474 = vmatpush.bf16.msrb.mxu2 %v2842_v46 }
 0x1fb   : > { %1475 = vmatpush.bf16.msrb.mxu2 %v2834_v55 }
 0x1fe   : > { %1275 = vmatmul.bf16.gmra.mxu2 %v1106_v1 }
 0x205   : > { %1530 = vmatmul.bf16.gmra.mxu3 %v2947_v20 }
 0x206   : > { %1304 = vmatmul.bf16.gmra.mxu1 %v1102_v31  ;;  %v4500_v31 = vperm.slane %v1566_v38, 0 }
 0x20e   : > { %1476 = vmatmul.bf16.vlgmr.msrb.gmra.mxu2 %v2946_v56 }
 0x215   : > { %1535 = vmatmul.bf16.gmra.mxu3 %v2948_v29 }
 0x216   : > { %1309 = vmatmul.bf16.gmra.mxu1 %v4224_v16 }
 0x21e   : > { %1481 = vmatmul.bf16.gmra.mxu2 %v2947_v20 }
 0x225   : > { %1540 = vmatmul.bf16.gmra.mxu3 %v2949_v8 }
 0x226   : > { %1314 = vmatmul.bf16.gmra.mxu1 %v4330_v60 }
 0x22e   : > { %1486 = vmatmul.bf16.gmra.mxu2 %v2948_v29 }
 0x235   : > { %1545 = vmatmul.bf16.gmra.mxu3 %v2950_v3 }
 0x236   : > { %1319 = vmatmul.bf16.gmra.mxu1 %v4400_v15 }
 0x23e   : > { %1491 = vmatmul.bf16.gmra.mxu2 %v2949_v8 }
 0x245   : > { %1550 = vmatmul.bf16.gmra.mxu3 %v2951_v7 }
 0x246   : > { %1324 = vmatmul.bf16.gmra.mxu1 %v1106_v1 }
 0x24e   : > { %1496 = vmatmul.bf16.gmra.mxu2 %v2950_v3 }
 0x253   : > { %v4446_v21 = vpop.f32.mrf.mxu1 }
 0x255   : > { %1555 = vmatmul.bf16.gmra.mxu3 %v2952_v6 }
 0x256   : > { %1329 = vmatmul.bf16.gmra.mxu1 %v4218_v32 }
 0x258   : > { %v4449_v16 = vpop.f32.mrf.mxu3 }
 0x25b   : > { %v4451_v60 = vpop.f32.mrf.mxu1 }
 0x25e   : > { %1501 = vmatmul.bf16.gmra.mxu2 %v2951_v7 }
 0x260   : > { %v4453_v48 = vpop.f32.mrf.mxu3 }
 0x262   : > { %v1251_v22 = vpop.f32.mrf.mxu0 }
 0x263   : > { %v4456_v17 = vpop.f32.mrf.mxu1 }
 0x265   : > { %1560 = vmatmul.bf16.gmra.mxu3 %v2953_v36 }
 0x266   : > { %1334 = vmatmul.bf16.gmra.mxu1 %v4284_v27 }
 0x268   : > { %v4459_v28 = vpop.f32.mrf.mxu3 }
 0x26a   : > { %v1253_v26 = vpop.f32.mrf.mxu0 }
 0x26b   : > { %v4461_v53 = vpop.f32.mrf.mxu1 }
 0x26e   : > { %1506 = vmatmul.bf16.gmra.mxu2 %v2952_v6 }
 0x270   : > { %v4465_v32 = vpop.f32.mrf.mxu3 }
 0x271   : > { %v4463_v33 = vpop.f32.mrf.mxu2 }
 0x272   : > { %v1256_v1 = vpop.f32.mrf.mxu0 }
 0x273   : > { %v1300_v18 = vpop.f32.mrf.mxu1 }
 0x278   : > { %v1526_v27 = vpop.f32.mrf.mxu3 }
 0x279   : > { %v4470_v14 = vpop.f32.mrf.mxu2  ;;  %v1527_v2 = vadd.f32 %v1526_v27, %v1300_v18 }
 0x27a   : > { %v1258_v27 = vpop.f32.mrf.mxu0 }
 0x27b   : > { %v1573_v25 = vadd.f32 %v4472_v34, %v1527_v2  ;;  %v1302_v58 = vpop.f32.mrf.mxu1 }
 0x27d   : > { %v1605_v35 = vmax.f32 %v1573_v25, 0.0 }
 0x27e   : > { %1511 = vmatmul.bf16.gmra.mxu2 %v2953_v36 }
 0x27f   : > { %v4480_v0 = vsel %vm1638_vm0, %v1605_v35, -1e+30 }
 0x280   : > { %v1528_v4 = vpop.f32.mrf.mxu3  ;;  %1655 = vmax.xlane.f32.xlu1 %v4480_v0 }
 0x281   : > { %v4482_v15 = vpop.f32.mrf.mxu2  ;;  %v1529_v39 = vadd.f32 %v1528_v4, %v1302_v58 }
 0x283   : > { %v1575_v19 = vadd.f32 %v4472_v34, %v1529_v39  ;;  %v1305_v5 = vpop.f32.mrf.mxu1 }
 0x285   : > { %v1607_v57 = vmax.f32 %v1575_v19, 0.0 }
 0x287   : > { %v4488_v9 = vsel %vm1638_vm0, %v1607_v57, -1e+30 }
 0x288   : > { %v1531_v59 = vpop.f32.mrf.mxu3  ;;  %1657 = vmax.xlane.f32.xlu2 %v4488_v9 }
 0x289   : > { %v4490_v52 = vpop.f32.mrf.mxu2  ;;  %v1532_v43 = vadd.f32 %v1531_v59, %v1305_v5 }
 0x28b   : > { %v1577_v12 = vadd.f32 %v4472_v34, %v1532_v43  ;;  %v1307_v54 = vpop.f32.mrf.mxu1 }
 0x28d   : > { %v1609_v45 = vmax.f32 %v1577_v12, 0.0 }
 0x28f   : > { %v4496_v24 = vsel %vm1638_vm0, %v1609_v45, -1e+30 }
 0x290   : > { %v1533_v62 = vpop.f32.mrf.mxu3  ;;  %1659 = vmax.xlane.f32.xlu0 %v4496_v24 }
 0x291   : > { %v1477_v10 = vpop.f32.mrf.mxu2  ;;  %v1534_v11 = vadd.f32 %v1533_v62, %v1307_v54 }
 0x292   : > { %v1478_v30 = vadd.f32 %v1477_v10, %v1251_v22 }
 0x293   : > { %v1579_v56 = vadd.f32 %v4472_v34, %v1534_v11  ;;  %v1310_v40 = vpop.f32.mrf.mxu1 }
 0x294   : > { %v1572_v61 = vadd.f32 %v4500_v31, %v1478_v30 }
 0x295   : > { %v1611_v47 = vmax.f32 %v1579_v56, 0.0 }
 0x296   : > { %v1604_v50 = vmax.f32 %v1572_v61, 0.0 }
 0x297   : > { %v4504_v13 = vsel %vm1638_vm0, %v1611_v47, -1e+30 }
 0x298   : > { %v1536_v23 = vpop.f32.mrf.mxu3  ;;  %1661 = vmax.xlane.f32.xlu2 %v4504_v13 }
 0x299   : > { %v1479_v63 = vpop.f32.mrf.mxu2  ;;  %v1537_v46 = vadd.f32 %v1536_v23, %v1310_v40 }
 0x29a   : > { %v1480_v42 = vadd.f32 %v1479_v63, %v1253_v26 }
 0x29b   : > { %v1581_v49 = vadd.f32 %v4472_v34, %v1537_v46  ;;  %v1312_v51 = vpop.f32.mrf.mxu1 }
 0x29c   : > { %v1574_v44 = vadd.f32 %v4500_v31, %v1480_v42 }
 0x29d   : > { %v1613_v20 = vmax.f32 %v1581_v49, 0.0 }
 0x29e   : > { %v1606_v55 = vmax.f32 %v1574_v44, 0.0 }
 0x29f   : > { %v4512_v8 = vsel %vm1638_vm0, %v1613_v20, -1e+30 }
 0x2a0   : > { %v2999_v29 = vpack.c.bf16 %v1606_v55, %v1604_v50  ;;  %v1538_v7 = vpop.f32.mrf.mxu3  ;;  %1663 = vmax.xlane.f32.xlu1 %v4512_v8 }
 0x2a1   : > { %v1482_v3 = vpop.f32.mrf.mxu2  ;;  %v1539_v6 = vadd.f32 %v1538_v7, %v1312_v51 }
 0x2a2   : > { %3000 = vst [vmem:[%s3877_s8] sm:$0xff] %v2999_v29   ;;  %v1483_v18 = vadd.f32 %v1482_v3, %v1256_v1 }
 0x2a3   : > { %v1583_v36 = vadd.f32 %v4472_v34, %v1539_v6  ;;  %v1315_v38 = vpop.f32.mrf.mxu1 }
 0x2a4   : > { %v1576_v58 = vadd.f32 %v4500_v31, %v1483_v18 }
 0x2a5   : > { %v1615_v37 = vmax.f32 %v1583_v36, 0.0 }
 0x2a6   : > { %v1608_v57 = vmax.f32 %v1576_v58, 0.0 }
 0x2a7   : > { %v4519_v2 = vsel %vm1638_vm0, %v1615_v37, -1e+30 }
 0x2a8   : > { %v1541_v35 = vpop.f32.mrf.mxu3  ;;  %1665 = vmax.xlane.f32.xlu2 %v4519_v2 }
 0x2a9   : > { %v1484_v25 = vpop.f32.mrf.mxu2  ;;  %v1542_v39 = vadd.f32 %v1541_v35, %v1315_v38 }
 0x2aa   : > { %v1485_v4 = vadd.f32 %v1484_v25, %v1258_v27 }
 0x2ab   : > { %v1585_v5 = vadd.f32 %v4472_v34, %v1542_v39  ;;  %v1317_v12 = vpop.f32.mrf.mxu1 }
 0x2ac   : > { %v1578_v19 = vadd.f32 %v4500_v31, %v1485_v4 }
 0x2ad   : > { %v1617_v22 = vmax.f32 %v1585_v5, 0.0 }
 0x2ae   : > { %v1610_v59 = vmax.f32 %v1578_v19, 0.0 }
 0x2af   : > { %v4527_v54 = vsel %vm1638_vm0, %v1617_v22, -1e+30 }
 0x2b0   : > { %v3004_v43 = vpack.c.bf16 %v1610_v59, %v1608_v57  ;;  %v1543_v10 = vpop.f32.mrf.mxu3  ;;  %1667 = vmax.xlane.f32.xlu0 %v4527_v54 }
 0x2b1   : > { %v1487_v45 = vpop.f32.mrf.mxu2  ;;  %v1544_v62 = vadd.f32 %v1543_v10, %v1317_v12 }
 0x2b2   : > { %3076 = vst [vmem:[%s3877_s8 + $0x8] sm:$0xff] %v3004_v43   ;;  %v1488_v26 = vadd.f32 %v1487_v45, %v4446_v21 }
 0x2b3   : > { %v1587_v11 = vadd.f32 %v4472_v34, %v1544_v62  ;;  %v1320_v63 = vpop.f32.mrf.mxu1 }
 0x2b4   : > { %v1580_v47 = vadd.f32 %v4500_v31, %v1488_v26 }
 0x2b5   : > { %v1619_v56 = vmax.f32 %v1587_v11, 0.0 }
 0x2b6   : > { %v1612_v44 = vmax.f32 %v1580_v47, 0.0 }
 0x2b7   : > { %v4535_v40 = vsel %vm1638_vm0, %v1619_v56, -1e+30 }
 0x2b8   : > { %v1546_v61 = vpop.f32.mrf.mxu3  ;;  %1669 = vmax.xlane.f32.xlu1 %v4535_v40 }
 0x2b9   : > { %v1489_v30 = vpop.f32.mrf.mxu2  ;;  %v1547_v42 = vadd.f32 %v1546_v61, %v1320_v63 }
 0x2ba   : > { %v1490_v23 = vadd.f32 %v1489_v30, %v4451_v60 }
 0x2bb   : > { %v1589_v21 = vadd.f32 %v4472_v34, %v1547_v42  ;;  %v1322_v12 = vpop.f32.mrf.mxu1 }
 0x2bc   : > { %v1582_v46 = vadd.f32 %v4500_v31, %v1490_v23 }
 0x2bd   : > { %v1621_v51 = vmax.f32 %v1589_v21, 0.0 }
 0x2be   : > { %v1614_v49 = vmax.f32 %v1582_v46, 0.0 }
 0x2bf   : > { %v4544_v55 = vsel %vm1638_vm0, %v1621_v51, -1e+30 }
 0x2c0   : > { %v3009_v50 = vpack.c.bf16 %v1614_v49, %v1612_v44  ;;  %1671 = vmax.xlane.f32.xlu1 %v4544_v55  ;;  %v1548_v22 = vpop.f32.mrf.mxu3 }
 0x2c1   : > { %v1492_v1 = vpop.f32.mrf.mxu2  ;;  %v1549_v61 = vadd.f32 %v1548_v22, %v1322_v12 }
 0x2c2   : > { %3077 = vst [vmem:[%s3877_s8 + $0x10] sm:$0xff] %v3009_v50   ;;  %v1493_v60 = vadd.f32 %v1492_v1, %v4456_v17 }
 0x2c3   : > { %v1325_v30 = vpop.f32.mrf.mxu1 }
 0x2c4   : > { %v1584_v29 = vadd.f32 %v4500_v31, %v1493_v60 }
 0x2c6   : > { %v1616_v6 = vmax.f32 %v1584_v29, 0.0 }
 0x2c9   : > { %v1494_v20 = vpop.f32.mrf.mxu2 }
 0x2ca   : > { %v1495_v3 = vadd.f32 %v1494_v20, %v4461_v53 }
 0x2cc   : > { %v1586_v7 = vadd.f32 %v4500_v31, %v1495_v3 }
 0x2ce   : > { %v1618_v36 = vmax.f32 %v1586_v7, 0.0 }
 0x2d0   : > { %v3014_v18 = vpack.c.bf16 %v1618_v36, %v1616_v6 }
 0x2d1   : > { %v1497_v38 = vpop.f32.mrf.mxu2 }
 0x2d2   : > { %3078 = vst [vmem:[%s3877_s8 + $0x18] sm:$0xff] %v3014_v18   ;;  %v1498_v37 = vadd.f32 %v1497_v38, %v4463_v33 }
 0x2d4   : > { %v1588_v25 = vadd.f32 %v4500_v31, %v1498_v37 }
 0x2d6   : > { %v1620_v35 = vmax.f32 %v1588_v25, 0.0 }
 0x2d9   : > { %v1499_v27 = vpop.f32.mrf.mxu2 }
 0x2da   : > { %v1500_v17 = vadd.f32 %v1499_v27, %v4470_v14 }
 0x2dc   : > { %v1590_v58 = vadd.f32 %v4500_v31, %v1500_v17 }
 0x2de   : > { %v1622_v53 = vmax.f32 %v1590_v58, 0.0 }
 0x2e0   : > { %v3019_v4 = vpack.c.bf16 %v1622_v53, %v1620_v35 }
 0x2e1   : > { %v1502_v39 = vpop.f32.mrf.mxu2 }
 0x2e2   : > { %3079 = vst [vmem:[%s3877_s8 + $0x20] sm:$0xff] %v3019_v4   ;;  %v1503_v19 = vadd.f32 %v1502_v39, %v4482_v15  ;;  %v1551_v15 = vpop.f32.mrf.mxu3 }
 0x2e3   : > { %v1552_v60 = vadd.f32 %v1551_v15, %v1325_v30 }
 0x2e4   : > { %v1592_v57 = vadd.f32 %v4500_v31, %v1503_v19 }
 0x2e5   : > { %v1593_v6 = vadd.f32 %v4472_v34, %v1552_v60 }
 0x2e6   : > { %v1624_v43 = vmax.f32 %v1592_v57, 0.0 }
 0x2e7   : > { %v1625_v17 = vmax.f32 %v1593_v6, 0.0 }
 0x2e9   : > { %v1504_v5 = vpop.f32.mrf.mxu2 }
 0x2ea   : > { %v1505_v33 = vadd.f32 %v1504_v5, %v4490_v52  ;;  %v1553_v50 = vpop.f32.mrf.mxu3 }
 0x2ec   : > { %v1594_v59 = vadd.f32 %v4500_v31, %v1505_v33 }
 0x2ee   : > { %v1626_v14 = vmax.f32 %v1594_v59, 0.0 }
 0x2f0   : > { %v3024_v45 = vpack.c.bf16 %v1626_v14, %v1624_v43 }
 0x2f1   : > { %v1507_v10 = vpop.f32.mrf.mxu2 }
 0x2f2   : > { %3080 = vst [vmem:[%s3877_s8 + $0x28] sm:$0xff] %v3024_v45   ;;  %v1508_v11 = vadd.f32 %v1507_v10, %v4449_v16 }
 0x2f3   : > { %v1656_v62 = vpop.xlane.xlu1 %1655 }
 0x2f4   : > { %v1687_v26 = vsub.f32 %v4480_v0, %v1656_v62  ;;  %v1596_v52 = vadd.f32 %v4500_v31, %v1508_v11  ;;  %v1591_v0 = vadd.f32 %v4472_v34, %v1549_v61 }
 0x2f6   : > { %v1703_v56 = vmul.f32 1.442695, %v1687_v26  ;;  %v1628_v46 = vmax.f32 %v1596_v52, 0.0  ;;  %v1623_v20 = vmax.f32 %v1591_v0, 0.0 }
 0x2f8   : > { %3315 = vpow2.f32 %v1703_v56  ;;  %v4581_v18 = vsel %vm1638_vm0, %v1623_v20, -1e+30 }
 0x2f9   : > { %v1509_v47 = vpop.f32.mrf.mxu2 }
 0x2fa   : > { %v1510_v63 = vadd.f32 %v1509_v47, %v4453_v48  ;;  %v1327_v48 = vpop.f32.mrf.mxu1 }
 0x2fb   : > { %v1658_v42 = vpop.xlane.xlu2 %1657  ;;  %v1554_v27 = vadd.f32 %v1553_v50, %v1327_v48 }
 0x2fc   : > { %v1598_v23 = vadd.f32 %v4500_v31, %v1510_v63  ;;  %v1688_v16 = vsub.f32 %v4488_v9, %v1658_v42 }
 0x2fd   : > { %v1595_v5 = vadd.f32 %v4472_v34, %v1554_v27  ;;  %v2992_v27 = vld [vmem:[#allocation4 + $0x30] sm:$0xff] }
 0x2fe   : > { %v1630_v21 = vmax.f32 %v1598_v23, 0.0  ;;  %v4569_v44 = vpop.eup %3315  ;;  %v1705_v51 = vmul.f32 1.442695, %v1688_v16  ;;  %v2993_v23 = vld [vmem:[#allocation4 + $0x38] sm:$0xff] }
 0x2ff   : > { %1735 = vadd.xlane.f32.xlu2 %v4569_v44  ;;  %v1627_v59 = vmax.f32 %v1595_v5, 0.0  ;;  %2079 = vmatpush.bf16.msrb.mxu0 %v2993_v23 }
 0x300   : > { %v3029_v49 = vpack.c.bf16 %v1630_v21, %v1628_v46  ;;  %3317 = vpow2.f32 %v1705_v51 }
 0x301   : > { %v1512_v1 = vpop.f32.mrf.mxu2  ;;  %v4605_v62 = vsel %vm1638_vm0, %v1627_v59, -1e+30 }
 0x302   : > { %3081 = vst [vmem:[%s3877_s8 + $0x30] sm:$0xff] %v3029_v49   ;;  %v1513_v3 = vadd.f32 %v1512_v1, %v4459_v28  ;;  %v1330_v58 = vpop.f32.mrf.mxu1 }
 0x303   : > { %v1660_v29 = vpop.xlane.xlu0 %1659  ;;  %2080 = vmatpush.bf16.msrb.mxu0 %v2992_v27 }
 0x304   : > { %v1689_v9 = vsub.f32 %v4496_v24, %v1660_v29  ;;  %v1600_v37 = vadd.f32 %v4500_v31, %v1513_v3  ;;  %v1556_v24 = vpop.f32.mrf.mxu3 }
 0x306   : > { %v4576_v7 = vpop.eup %3317  ;;  %v1707_v36 = vmul.f32 1.442695, %v1689_v9  ;;  %v1632_v53 = vmax.f32 %v1600_v37, 0.0 }
 0x307   : > { %1673 = vmax.xlane.f32.xlu2 %v4581_v18  ;;  %1737 = vadd.xlane.f32.xlu0 %v4576_v7 }
 0x308   : > { %3319 = vpow2.f32 %v1707_v36 }
 0x309   : > { %v1514_v38 = vpop.f32.mrf.mxu2 }
 0x30a   : > { %v1515_v28 = vadd.f32 %v1514_v38, %v4465_v32  ;;  %v4594_v32 = vsel %vm1638_vm0, %v1625_v17, -1e+30  ;;  %v1332_v14 = vpop.f32.mrf.mxu1  ;;  %v2989_v17 = vld [vmem:[#allocation4 + $0x18] sm:$0xff] }
 0x30b   : > { %v1662_v35 = vpop.xlane.xlu2 %1661 }
 0x30c   : > { %v1602_v25 = vadd.f32 %v4500_v31, %v1515_v28  ;;  %v1690_v39 = vsub.f32 %v4504_v13, %v1662_v35  ;;  %v1557_v31 = vadd.f32 %v1556_v24, %v1330_v58  ;;  %v1558_v22 = vpop.f32.mrf.mxu3  ;;  %v2987_v35 = vld [vmem:[#allocation4 + $0x8] sm:$0xff] }
 0x30d   : > { %v1559_v11 = vadd.f32 %v1558_v22, %v1332_v14 }
 0x30e   : > { %v1634_v4 = vmax.f32 %v1602_v25, 0.0  ;;  %v4589_v19 = vpop.eup %3319  ;;  %v1709_v33 = vmul.f32 1.442695, %v1690_v39  ;;  %v1597_v45 = vadd.f32 %v4472_v34, %v1557_v31  ;;  %v2991_v25 = vld [vmem:[#allocation4 + $0x28] sm:$0xff] }
 0x30f   : > { %1675 = vmax.xlane.f32.xlu2 %v4594_v32  ;;  %1739 = vadd.xlane.f32.xlu0 %v4589_v19  ;;  %v1599_v47 = vadd.f32 %v4472_v34, %v1559_v11 }
 0x310   : > { %v3034_v57 = vpack.c.bf16 %v1634_v4, %v1632_v53  ;;  %3321 = vpow2.f32 %v1709_v33  ;;  %v1629_v26 = vmax.f32 %v1597_v45, 0.0  ;;  %2081 = vmatpush.bf16.msrb.mxu0 %v2991_v25  ;;  %v2986_v53 = vld [vmem:[#allocation4] sm:$0xff] }
 0x312   : > { %3082 = vst [vmem:[%s3877_s8 + $0x38] sm:$0xff] %v3034_v57   ;;  %v4615_v63 = vsel %vm1638_vm0, %v1629_v26, -1e+30  ;;  %v1335_v61 = vpop.f32.mrf.mxu1 }
 0x313   : > { %v1664_v13 = vpop.xlane.xlu1 %1663 }
 0x314   : > { %v1691_v43 = vsub.f32 %v4512_v8, %v1664_v13  ;;  %v1561_v56 = vpop.f32.mrf.mxu3 }
 0x315   : > { %v1562_v42 = vadd.f32 %v1561_v56, %v1335_v61 }
 0x316   : > { %v4600_v12 = vpop.eup %3321  ;;  %v1711_v10 = vmul.f32 1.442695, %v1691_v43 }
 0x317   : > { %1677 = vmax.xlane.f32.xlu0 %v4605_v62  ;;  %1741 = vadd.xlane.f32.xlu1 %v4600_v12  ;;  %v1601_v0 = vadd.f32 %v4472_v34, %v1562_v42 }
 0x318   : > { %3323 = vpow2.f32 %v1711_v10 }
 0x319   : > { %v1633_v60 = vmax.f32 %v1601_v0, 0.0 }
 0x31a   : > { %v1337_v1 = vpop.f32.mrf.mxu1 }
 0x31b   : > { %v1666_v15 = vpop.xlane.xlu2 %1665  ;;  %v4635_v6 = vsel %vm1638_vm0, %v1633_v60, -1e+30 }
 0x31c   : > { %v1692_v8 = vsub.f32 %v4519_v2, %v1666_v15  ;;  %v1631_v2 = vmax.f32 %v1599_v47, 0.0  ;;  %v1563_v50 = vpop.f32.mrf.mxu3 }
 0x31d   : > { %v1564_v48 = vadd.f32 %v1563_v50, %v1337_v1 }
 0x31e   : > { %v4610_v30 = vpop.eup %3323  ;;  %v1713_v52 = vmul.f32 1.442695, %v1692_v8  ;;  %v4625_v51 = vsel %vm1638_vm0, %v1631_v2, -1e+30 }
 0x31f   : > { %1679 = vmax.xlane.f32.xlu0 %v4615_v63  ;;  %1743 = vadd.xlane.f32.xlu1 %v4610_v30  ;;  %v1603_v3 = vadd.f32 %v4472_v34, %v1564_v48 }
 0x320   : > { %3325 = vpow2.f32 %v1713_v52 }
 0x321   : > { %v1635_v36 = vmax.f32 %v1603_v3, 0.0 }
 0x323   : > { %v1668_v46 = vpop.xlane.xlu0 %1667  ;;  %v4644_v34 = vsel %vm1638_vm0, %v1635_v36, -1e+30 }
 0x324   : > { %v1693_v21 = vsub.f32 %v4527_v54, %v1668_v46 }
 0x326   : > { %v4620_v16 = vpop.eup %3325  ;;  %v1715_v49 = vmul.f32 1.442695, %v1693_v21 }
 0x327   : > { %1681 = vmax.xlane.f32.xlu1 %v4625_v51  ;;  %1745 = vadd.xlane.f32.xlu2 %v4620_v16 }
 0x328   : > { %3327 = vpow2.f32 %v1715_v49 }
 0x32b   : > { %v1670_v20 = vpop.xlane.xlu1 %1669 }
 0x32c   : > { %v1694_v54 = vsub.f32 %v4535_v40, %v1670_v20 }
 0x32e   : > { %v4630_v29 = vpop.eup %3327  ;;  %v1717_v9 = vmul.f32 1.442695, %v1694_v54 }
 0x32f   : > { %1683 = vmax.xlane.f32.xlu1 %v4635_v6  ;;  %1747 = vadd.xlane.f32.xlu2 %v4630_v29 }
 0x330   : > { %3329 = vpow2.f32 %v1717_v9 }
 0x333   : > { %v1672_v38 = vpop.xlane.xlu1 %1671 }
 0x334   : > { %v1695_v37 = vsub.f32 %v4544_v55, %v1672_v38  ;;  %v2990_v55 = vld [vmem:[#allocation4 + $0x20] sm:$0xff] }
 0x335   : > { %2082 = vmatpush.bf16.msrb.mxu0 %v2990_v55 }
 0x336   : > { %v4640_v28 = vpop.eup %3329  ;;  %v1719_v40 = vmul.f32 1.442695, %v1695_v37 }
 0x337   : > { %1749 = vadd.xlane.f32.xlu0 %v4640_v28  ;;  %1685 = vmax.xlane.f32.xlu2 %v4644_v34 }
 0x338   : > { %3331 = vpow2.f32 %v1719_v40 }
 0x339   : > { %2083 = vmatpush.bf16.msrb.mxu0 %v2989_v17 }
 0x33d   : > { %2084 = vmatpush.bf16.msrb.mxu0 %v2988_v41 }
 0x33e   : > { %v4648_v24 = vpop.eup %3331 }
 0x33f   : > { %1751 = vadd.xlane.f32.xlu0 %v4648_v24 }
 0x341   : > { %2085 = vmatpush.bf16.msrb.mxu0 %v2987_v35 }
 0x345   : > { %2086 = vmatpush.bf16.msrb.mxu0 %v2986_v53 }
 0x372   : > { %v1736_v58 = vpop.xlane.xlu2 %1735 }
 0x373   : > { %3333 = vrcp.f32 %v1736_v58  ;;  %v1778_v26 = vand.u32 2147483648, %v1736_v58  ;;  %vm1772_vm2 = vweird.f32 %v1736_v58  ;;  %v1776_v8 = vand.u32 2147483647, %v1736_v58 }
 0x375   : > { %v1779_v42 = vor.u32 1.1754944e-38, %v1778_v26  ;;  %vm1777_vm6 = vcmp.eq.f32.partialorder %v1776_v8, 8.507059e+37 }
 0x379   : > { %v3334_v4 = vpop.eup %3333 }
 0x37a   : > { %v1768_v39 = vmul.f32 %v3334_v4, %v1736_v58  ;;  %v1738_v5 = vpop.xlane.xlu0 %1737  ;;  %v1674_v57 = vpop.xlane.xlu2 %1673  ;;  %vm1773_vm1 = vweird.f32 %v3334_v4 }
 0x37b   : > { %3335 = vrcp.f32 %v1738_v5  ;;  %v1696_v31 = vsub.f32 %v4581_v18, %v1674_v57  ;;  %vm4658_vm3 = vmor %vm1772_vm2, %vm1773_vm1  ;;  %v1793_v61 = vand.u32 2147483648, %v1738_v5  ;;  %v1791_v23 = vand.u32 2147483647, %v1738_v5 }
 0x37c   : > { %v1769_v33 = vsub.f32 1.0, %v1768_v39  ;;  %vm1787_vm5 = vweird.f32 %v1738_v5 }
 0x37d   : > { %v1721_v59 = vmul.f32 1.442695, %v1696_v31  ;;  %v1794_v21 = vor.u32 1.1754944e-38, %v1793_v61  ;;  %vm1792_vm8 = vcmp.eq.f32.partialorder %v1791_v23, 8.507059e+37 }
 0x37e   : > { %v1770_v22 = vmul.f32 %v3334_v4, %v1769_v33 }
 0x37f   : > { %3337 = vpow2.f32 %v1721_v59 }
 0x380   : > { %v1771_v10 = vadd.f32 %v3334_v4, %v1770_v22 }
 0x381   : > { %v3336_v13 = vpop.eup %3335 }
 0x382   : > { %v1783_v43 = vmul.f32 %v3336_v13, %v1738_v5  ;;  %v4652_v14 = vpop.xlane.xlu0 %1739  ;;  %v1676_v45 = vpop.xlane.xlu2 %1675  ;;  %vm1788_vm4 = vweird.f32 %v3336_v13 }
 0x383   : > { %3339 = vrcp.f32 %v4652_v14  ;;  %v1697_v11 = vsub.f32 %v4594_v32, %v1676_v45  ;;  %v1775_v32 = vsel %vm4658_vm3, %v3334_v4, %v1771_v10  ;;  %vm1789_vm7 = vmor %vm1787_vm5, %vm1788_vm4  ;;  %vm1802_vm10 = vweird.f32 %v4652_v14 }
 0x384   : > { %v1784_v15 = vsub.f32 1.0, %v1783_v43  ;;  %v1780_v1 = vsel %vm1777_vm6, %v1779_v42, %v1775_v32  ;;  %v1806_v53 = vand.u32 2147483647, %v4652_v14 }
 0x385   : > { %v1723_v56 = vmul.f32 1.442695, %v1697_v11  ;;  %v4656_v18 = vpop.eup %3337  ;;  %v1781_v36 = vmul.f32 %v4569_v44, %v1780_v1  ;;  %v1808_v44 = vand.u32 2147483648, %v4652_v14 }
 0x386   : > { %v1785_v52 = vmul.f32 %v3336_v13, %v1784_v15  ;;  %1753 = vadd.xlane.f32.xlu1 %v4656_v18  ;;  %vm1807_vm14 = vcmp.eq.f32.partialorder %v1806_v53, 8.507059e+37 }
 0x387   : > { %3341 = vpow2.f32 %v1723_v56  ;;  %v1809_v57 = vor.u32 1.1754944e-38, %v1808_v44 }
 0x388   : > { %v1786_v2 = vadd.f32 %v3336_v13, %v1785_v52 }
 0x389   : > { %v3340_v46 = vpop.eup %3339 }
 0x38a   : > { %v1798_v0 = vmul.f32 %v3340_v46, %v4652_v14  ;;  %v1678_v49 = vpop.xlane.xlu0 %1677  ;;  %v1742_v50 = vpop.xlane.xlu1 %1741  ;;  %v1790_v48 = vsel %vm1789_vm7, %v3336_v13, %v1786_v2  ;;  %vm1803_vm9 = vweird.f32 %v3340_v46  ;;  %v3658_v2 = vmov 0  }
 0x38b   : > { %v1698_v60 = vsub.f32 %v4605_v62, %v1678_v49  ;;  %3343 = vrcp.f32 %v1742_v50  ;;  %v1795_v54 = vsel %vm1792_vm8, %v1794_v21, %v1790_v48  ;;  %v1823_v39 = vand.u32 2147483648, %v1742_v50  ;;  %vm1804_vm11 = vmor %vm1802_vm10, %vm1803_vm9  ;;  %3280 = vset.pattern.permute.xlu0 %v3658_v2  ;;  %3279 = vset.pattern.permute.xlu2 %v3658_v2 }
 0x38c   : > { %v1799_v20 = vsub.f32 1.0, %v1798_v0  ;;  %v1796_v38 = vmul.f32 %v4576_v7, %v1795_v54  ;;  %v1821_v5 = vand.u32 2147483647, %v1742_v50  ;;  %vm1817_vm13 = vweird.f32 %v1742_v50  ;;  %3281 = vset.pattern.permute.xlu1 %v3658_v2  ;;  %v2143_v2 = vld [vmem:[%s3871_s28 + $0x70] sm:$0xff] }
 0x38d   : > { %v4667_v3 = vpop.eup %3341  ;;  %v1725_v9 = vmul.f32 1.442695, %v1698_v60  ;;  %v1824_v45 = vor.u32 1.1754944e-38, %v1823_v39 }
 0x38e   : > { %1755 = vadd.xlane.f32.xlu2 %v4667_v3  ;;  %v1800_v37 = vmul.f32 %v3340_v46, %v1799_v20  ;;  %v2007_v40 = vpack.c.bf16 %v1796_v38, %v1781_v36  ;;  %vm1822_vm0 = vcmp.eq.f32.partialorder %v1821_v5, 8.507059e+37 }
 0x38f   : > { %3345 = vpow2.f32 %v1725_v9 }
 0x390   : > { %2087 = vmatmul.bf16.vlgmr.msrb.gmra.mxu0 %v2007_v40  ;;  %v1801_v41 = vadd.f32 %v3340_v46, %v1800_v37 }
 0x391   : > { %v3344_v27 = vpop.eup %3343 }
 0x392   : > { %v1813_v25 = vmul.f32 %v3344_v27, %v1742_v50  ;;  %v1680_v55 = vpop.xlane.xlu0 %1679  ;;  %v4672_v62 = vpop.xlane.xlu1 %1743  ;;  %vm1818_vm12 = vweird.f32 %v3344_v27 }
 0x393   : > { %v1699_v17 = vsub.f32 %v4615_v63, %v1680_v55  ;;  %3347 = vrcp.f32 %v4672_v62  ;;  %v1805_v63 = vsel %vm1804_vm11, %v3340_v46, %v1801_v41  ;;  %vm1819_vm15 = vmor %vm1817_vm13, %vm1818_vm12  ;;  %vm1832_vm2 = vweird.f32 %v4672_v62 }
 0x394   : > { %v1814_v7 = vsub.f32 1.0, %v1813_v25  ;;  %v1810_v43 = vsel %vm1807_vm14, %v1809_v57, %v1805_v63  ;;  %v1836_v50 = vand.u32 2147483647, %v4672_v62 }
 0x395   : > { %v4677_v58 = vpop.eup %3345  ;;  %v1727_v35 = vmul.f32 1.442695, %v1699_v17  ;;  %v1811_v56 = vmul.f32 %v4589_v19, %v1810_v43 }
 0x396   : > { %v1815_v4 = vmul.f32 %v3344_v27, %v1814_v7  ;;  %1757 = vadd.xlane.f32.xlu0 %v4677_v58  ;;  %vm1837_vm6 = vcmp.eq.f32.partialorder %v1836_v50, 8.507059e+37  ;;  %v2141_v50 = vld [vmem:[%s3871_s28 + $0x60] sm:$0xff] }
 0x397   : > { %3349 = vpow2.f32 %v1727_v35 }
 0x398   : > { %v1816_v33 = vadd.f32 %v3344_v27, %v1815_v4 }
 0x399   : > { %v3348_v31 = vpop.eup %3347 }
 0x39a   : > { %v1828_v59 = vmul.f32 %v3348_v31, %v4672_v62  ;;  %v1682_v22 = vpop.xlane.xlu1 %1681  ;;  %v1746_v13 = vpop.xlane.xlu2 %1745  ;;  %v1820_v14 = vsel %vm1819_vm15, %v3344_v27, %v1816_v33  ;;  %vm1833_vm1 = vweird.f32 %v3348_v31 }
 0x39b   : > { %v1700_v10 = vsub.f32 %v4625_v51, %v1682_v22  ;;  %3351 = vrcp.f32 %v1746_v13  ;;  %v1825_v26 = vsel %vm1822_vm0, %v1824_v45, %v1820_v14  ;;  %v1853_v48 = vand.u32 2147483648, %v1746_v13  ;;  %vm1834_vm3 = vmor %vm1832_vm2, %vm1833_vm1 }
 0x39c   : > { %v1829_v11 = vsub.f32 1.0, %v1828_v59  ;;  %v1826_v47 = vmul.f32 %v4600_v12, %v1825_v26  ;;  %v1838_v12 = vand.u32 2147483648, %v4672_v62  ;;  %v1851_v60 = vand.u32 2147483647, %v1746_v13  ;;  %v2129_v26 = vld [vmem:[%s3871_s28] sm:$0xff] }
 0x39d   : > { %v4684_v15 = vpop.eup %3349  ;;  %v1729_v8 = vmul.f32 1.442695, %v1700_v10  ;;  %vm1847_vm5 = vweird.f32 %v1746_v13  ;;  %v1854_v25 = vor.u32 1.1754944e-38, %v1853_v48  ;;  %v2144_v48 = vld [vmem:[%s3871_s28 + $0x78] sm:$0xff] }
 0x39e   : > { %1759 = vadd.xlane.f32.xlu1 %v4684_v15  ;;  %v1830_v52 = vmul.f32 %v3348_v31, %v1829_v11  ;;  %v2008_v61 = vpack.c.bf16 %v1826_v47, %v1811_v56  ;;  %v1839_v20 = vor.u32 1.1754944e-38, %v1838_v12  ;;  %vm1852_vm8 = vcmp.eq.f32.partialorder %v1851_v60, 8.507059e+37  ;;  %v2138_v12 = vld [vmem:[%s3871_s28 + $0x48] sm:$0xff] }
 0x39f   : > { %3353 = vpow2.f32 %v1729_v8 }
 0x3a0   : > { %2092 = vmatmul.bf16.gmra.mxu0 %v2008_v61  ;;  %v1831_v19 = vadd.f32 %v3348_v31, %v1830_v52  ;;  %v2130_v52 = vld [vmem:[%s3871_s28 + $0x8] sm:$0xff]  ;;  %v2132_v61 = vld [vmem:[%s3871_s28 + $0x18] sm:$0xff] }
 0x3a1   : > { %v3352_v23 = vpop.eup %3351 }
 0x3a2   : > { %v1843_v32 = vmul.f32 %v3352_v23, %v1746_v13  ;;  %v1684_v51 = vpop.xlane.xlu1 %1683  ;;  %v4689_v42 = vpop.xlane.xlu2 %1747  ;;  %vm1848_vm4 = vweird.f32 %v3352_v23 }
 0x3a3   : > { %v1701_v46 = vsub.f32 %v4635_v6, %v1684_v51  ;;  %3355 = vrcp.f32 %v4689_v42  ;;  %v1835_v6 = vsel %vm1834_vm3, %v3348_v31, %v1831_v19  ;;  %vm1849_vm7 = vmor %vm1847_vm5, %vm1848_vm4  ;;  %vm1862_vm10 = vweird.f32 %v4689_v42  ;;  %v2131_v51 = vld [vmem:[%s3871_s28 + $0x10] sm:$0xff] }
 0x3a4   : > { %v1844_v21 = vsub.f32 1.0, %v1843_v32  ;;  %v1840_v40 = vsel %vm1837_vm6, %v1839_v20, %v1835_v6  ;;  %v1866_v33 = vand.u32 2147483647, %v4689_v42  ;;  %v2134_v32 = vld [vmem:[%s3871_s28 + $0x28] sm:$0xff]  ;;  %v2135_v19 = vld [vmem:[%s3871_s28 + $0x30] sm:$0xff] }
 0x3a5   : > { %v4694_v0 = vpop.eup %3353  ;;  %v1731_v49 = vmul.f32 1.442695, %v1701_v46  ;;  %v1841_v7 = vmul.f32 %v4610_v30, %v1840_v40  ;;  %v2139_v46 = vld [vmem:[%s3871_s28 + $0x50] sm:$0xff] }
 0x3a6   : > { %v1845_v1 = vmul.f32 %v3352_v23, %v1844_v21  ;;  %1761 = vadd.xlane.f32.xlu2 %v4694_v0  ;;  %vm1867_vm14 = vcmp.eq.f32.partialorder %v1866_v33, 8.507059e+37  ;;  %v2142_v21 = vld [vmem:[%s3871_s28 + $0x68] sm:$0xff] }
 0x3a7   : > { %3357 = vpow2.f32 %v1731_v49 }
 0x3a8   : > { %v1846_v54 = vadd.f32 %v3352_v23, %v1845_v1 }
 0x3a9   : > { %v3356_v9 = vpop.eup %3355 }
 0x3aa   : > { %v1858_v36 = vmul.f32 %v3356_v9, %v4689_v42  ;;  %v1750_v38 = vpop.xlane.xlu0 %1749  ;;  %v1686_v37 = vpop.xlane.xlu2 %1685  ;;  %v1850_v27 = vsel %vm1849_vm7, %v3352_v23, %v1846_v54  ;;  %vm1863_vm9 = vweird.f32 %v3356_v9  ;;  %v2137_v23 = vld [vmem:[%s3871_s28 + $0x40] sm:$0xff] }
 0x3ab   : > { %3359 = vrcp.f32 %v1750_v38  ;;  %v1702_v55 = vsub.f32 %v4644_v34, %v1686_v37  ;;  %v1855_v17 = vsel %vm1852_vm8, %v1854_v25, %v1850_v27  ;;  %v1868_v34 = vand.u32 2147483648, %v4689_v42  ;;  %vm1864_vm11 = vmor %vm1862_vm10, %vm1863_vm9  ;;  %v2133_v42 = vld [vmem:[%s3871_s28 + $0x20] sm:$0xff] }
 0x3ac   : > { %v1859_v62 = vsub.f32 1.0, %v1858_v36  ;;  %v1856_v35 = vmul.f32 %v4620_v16, %v1855_v17  ;;  %v1883_v16 = vand.u32 2147483648, %v1750_v38  ;;  %v1881_v22 = vand.u32 2147483647, %v1750_v38 }
 0x3ad   : > { %v4701_v41 = vpop.eup %3357  ;;  %v1733_v44 = vmul.f32 1.442695, %v1702_v55  ;;  %v1869_v13 = vor.u32 1.1754944e-38, %v1868_v34  ;;  %vm1877_vm13 = vweird.f32 %v1750_v38 }
 0x3ae   : > { %v1860_v53 = vmul.f32 %v3356_v9, %v1859_v62  ;;  %1763 = vadd.xlane.f32.xlu0 %v4701_v41  ;;  %v2009_v4 = vpack.c.bf16 %v1856_v35, %v1841_v7  ;;  %v1884_v45 = vor.u32 1.1754944e-38, %v1883_v16  ;;  %vm1882_vm0 = vcmp.eq.f32.partialorder %v1881_v22, 8.507059e+37 }
 0x3af   : > { %3361 = vpow2.f32 %v1733_v44 }
 0x3b0   : > { %2097 = vmatmul.bf16.gmra.mxu0 %v2009_v4  ;;  %v1861_v5 = vadd.f32 %v3356_v9, %v1860_v53 }
 0x3b1   : > { %v3360_v39 = vpop.eup %3359 }
 0x3b2   : > { %v1873_v63 = vmul.f32 %v3360_v39, %v1750_v38  ;;  %v1865_v59 = vsel %vm1864_vm11, %v3356_v9, %v1861_v5  ;;  %vm1878_vm12 = vweird.f32 %v3360_v39  ;;  %v1752_v49 = vpop.xlane.xlu0 %1751 }
 0x3b3   : > { %v1870_v14 = vsel %vm1867_vm14, %v1869_v13, %v1865_v59  ;;  %vm1879_vm15 = vmor %vm1877_vm13, %vm1878_vm12  ;;  %3363 = vrcp.f32 %v1752_v49  ;;  %v1898_v40 = vand.u32 2147483648, %v1752_v49  ;;  %vm1892_vm2 = vweird.f32 %v1752_v49 }
 0x3b4   : > { %v1874_v57 = vsub.f32 1.0, %v1873_v63  ;;  %v1871_v8 = vmul.f32 %v4630_v29, %v1870_v14  ;;  %v2140_v29 = vld [vmem:[%s3871_s28 + $0x58] sm:$0xff]  ;;  %v1896_v25 = vand.u32 2147483647, %v1752_v49 }
 0x3b5   : > { %v4709_v30 = vpop.eup %3361  ;;  %v1899_v7 = vor.u32 1.1754944e-38, %v1898_v40 }
 0x3b6   : > { %v1875_v31 = vmul.f32 %v3360_v39, %v1874_v57  ;;  %1765 = vadd.xlane.f32.xlu1 %v4709_v30  ;;  %vm1897_vm6 = vcmp.eq.f32.partialorder %v1896_v25, 8.507059e+37 }
 0x3b8   : > { %v1876_v43 = vadd.f32 %v3360_v39, %v1875_v31 }
 0x3b9   : > { %v3364_v1 = vpop.eup %3363 }
 0x3ba   : > { %v1880_v10 = vsel %vm1879_vm15, %v3360_v39, %v1876_v43  ;;  %v1888_v6 = vmul.f32 %v3364_v1, %v1752_v49  ;;  %vm1893_vm1 = vweird.f32 %v3364_v1 }
 0x3bb   : > { %v1885_v11 = vsel %vm1882_vm0, %v1884_v45, %v1880_v10  ;;  %vm1894_vm3 = vmor %vm1892_vm2, %vm1893_vm1 }
 0x3bc   : > { %v1886_v56 = vmul.f32 %v4640_v28, %v1885_v11  ;;  %v2136_v28 = vld [vmem:[%s3871_s28 + $0x38] sm:$0xff]  ;;  %v1889_v60 = vsub.f32 1.0, %v1888_v6 }
 0x3be   : > { %v2010_v47 = vpack.c.bf16 %v1886_v56, %v1871_v8  ;;  %2147 = vperm.xlu2 %3279, %v2129_v26   ;;  %v1890_v54 = vmul.f32 %v3364_v1, %v1889_v60 }
 0x3c0   : > { %2102 = vmatmul.bf16.gmra.mxu0 %v2010_v47  ;;  %v1891_v37 = vadd.f32 %v3364_v1, %v1890_v54 }
 0x3c2   : > { %2150 = vperm.xlu0 %3280, %v2130_v52   ;;  %v1895_v17 = vsel %vm1894_vm3, %v3364_v1, %v1891_v37 }
 0x3c3   : > { %v1900_v63 = vsel %vm1897_vm6, %v1899_v7, %v1895_v17 }
 0x3c4   : > { %v1901_v16 = vmul.f32 %v4648_v24, %v1900_v63 }
 0x3c6   : > { %2156 = vperm.xlu2 %3279, %v2132_v61  }
 0x3ca   : > { %2171 = vperm.xlu0 %3280, %v2137_v23  }
 0x3ce   : > { %2162 = vperm.xlu2 %3279, %v2134_v32  }
 0x3cf   : > { %2153 = vperm.xlu1 %3281, %v2131_v51  }
 0x3d2   : > { %2180 = vperm.xlu0 %3280, %v2140_v29  }
 0x3d6   : > { %2168 = vperm.xlu2 %3279, %v2136_v28  }
 0x3d7   : > { %2159 = vperm.xlu1 %3281, %v2133_v42  }
 0x3da   : > { %2189 = vperm.xlu0 %3280, %v2143_v2  }
 0x3de   : > { %2177 = vperm.xlu2 %3279, %v2139_v46  }
 0x3df   : > { %2165 = vperm.xlu1 %3281, %v2135_v19  }
 0x3e6   : > { %2186 = vperm.xlu2 %3279, %v2142_v21  }
 0x3e7   : > { %2174 = vperm.xlu1 %3281, %v2138_v12  }
 0x3ef   : > { %2183 = vperm.xlu1 %3281, %v2141_v50  }
 0x3f7   : > { %2192 = vperm.xlu1 %3281, %v2144_v48  }
 0x3f9   : > { %v1754_v20 = vpop.xlane.xlu1 %1753 }
 0x3fa   : > { %3365 = vrcp.f32 %v1754_v20  ;;  %v1913_v55 = vand.u32 2147483648, %v1754_v20  ;;  %v1911_v44 = vand.u32 2147483647, %v1754_v20  ;;  %vm1907_vm5 = vweird.f32 %v1754_v20 }
 0x3fc   : > { %v1914_v5 = vor.u32 1.1754944e-38, %v1913_v55  ;;  %vm1912_vm8 = vcmp.eq.f32.partialorder %v1911_v44, 8.507059e+37 }
 0x400   : > { %v3366_v9 = vpop.eup %3365 }
 0x401   : > { %v1756_v36 = vpop.xlane.xlu2 %1755  ;;  %v1903_v38 = vmul.f32 %v3366_v9, %v1754_v20  ;;  %vm1908_vm4 = vweird.f32 %v3366_v9 }
 0x402   : > { %3367 = vrcp.f32 %v1756_v36  ;;  %vm1909_vm7 = vmor %vm1907_vm5, %vm1908_vm4  ;;  %v1928_v11 = vand.u32 2147483648, %v1756_v36  ;;  %vm1922_vm10 = vweird.f32 %v1756_v36  ;;  %v1926_v8 = vand.u32 2147483647, %v1756_v36 }
 0x403   : > { %v1904_v27 = vsub.f32 1.0, %v1903_v38 }
 0x404   : > { %v1929_v61 = vor.u32 1.1754944e-38, %v1928_v11  ;;  %vm1927_vm14 = vcmp.eq.f32.partialorder %v1926_v8, 8.507059e+37 }
 0x405   : > { %v1905_v62 = vmul.f32 %v3366_v9, %v1904_v27 }
 0x407   : > { %v1906_v53 = vadd.f32 %v3366_v9, %v1905_v62 }
 0x408   : > { %v3368_v35 = vpop.eup %3367 }
 0x409   : > { %v1918_v4 = vmul.f32 %v3368_v35, %v1756_v36  ;;  %v1758_v39 = vpop.xlane.xlu0 %1757  ;;  %v1910_v34 = vsel %vm1909_vm7, %v3366_v9, %v1906_v53  ;;  %vm1923_vm9 = vweird.f32 %v3368_v35  ;;  %v4745_v53 = vld [vmem:[%s5002_s1] ss:$0 sm:$0xff] }
 0x40a   : > { %3369 = vrcp.f32 %v1758_v39  ;;  %v1915_v33 = vsel %vm1912_vm8, %v1914_v5, %v1910_v34  ;;  %v1943_v56 = vand.u32 2147483648, %v1758_v39  ;;  %vm1924_vm11 = vmor %vm1922_vm10, %vm1923_vm9  ;;  %vm1937_vm13 = vweird.f32 %v1758_v39 }
 0x40b   : > { %v1919_v57 = vsub.f32 1.0, %v1918_v4  ;;  %v1916_v31 = vmul.f32 %v4656_v18, %v1915_v33  ;;  %v1941_v18 = vand.u32 2147483647, %v1758_v39 }
 0x40c   : > { %v1944_v29 = vor.u32 1.1754944e-38, %v1943_v56 }
 0x40d   : > { %v1920_v59 = vmul.f32 %v3368_v35, %v1919_v57  ;;  %v4732_v22 = vpop.f32.mrf.mxu0  ;;  %v2011_v13 = vpack.c.bf16 %v1916_v31, %v1901_v16  ;;  %vm1942_vm0 = vcmp.eq.f32.partialorder %v1941_v18, 8.507059e+37 }
 0x40f   : > { %2107 = vmatmul.bf16.gmra.mxu0 %v2011_v13  ;;  %v1921_v10 = vadd.f32 %v3368_v35, %v1920_v59 }
 0x410   : > { %v3370_v43 = vpop.eup %3369 }
 0x411   : > { %v1933_v14 = vmul.f32 %v3370_v43, %v1758_v39  ;;  %v1760_v45 = vpop.xlane.xlu1 %1759  ;;  %v1925_v47 = vsel %vm1924_vm11, %v3368_v35, %v1921_v10  ;;  %vm1938_vm12 = vweird.f32 %v3370_v43 }
 0x412   : > { %3371 = vrcp.f32 %v1760_v45  ;;  %v1930_v51 = vsel %vm1927_vm14, %v1929_v61, %v1925_v47  ;;  %vm1939_vm15 = vmor %vm1937_vm13, %vm1938_vm12  ;;  %v1958_v54 = vand.u32 2147483648, %v1760_v45  ;;  %vm1952_vm2 = vweird.f32 %v1760_v45 }
 0x413   : > { %v1934_v26 = vsub.f32 1.0, %v1933_v14  ;;  %v1931_v12 = vmul.f32 %v4667_v3, %v1930_v51  ;;  %v1956_v36 = vand.u32 2147483647, %v1760_v45 }
 0x414   : > { %v1959_v40 = vor.u32 1.1754944e-38, %v1958_v54 }
 0x415   : > { %v1935_v24 = vmul.f32 %v3370_v43, %v1934_v26  ;;  %v4734_v52 = vpop.f32.mrf.mxu0  ;;  %vm1957_vm6 = vcmp.eq.f32.partialorder %v1956_v36, 8.507059e+37 }
 0x417   : > { %v1936_v23 = vadd.f32 %v3370_v43, %v1935_v24 }
 0x418   : > { %v3372_v32 = vpop.eup %3371 }
 0x419   : > { %v1948_v28 = vmul.f32 %v3372_v32, %v1760_v45  ;;  %v1762_v42 = vpop.xlane.xlu2 %1761  ;;  %v1940_v2 = vsel %vm1939_vm15, %v3370_v43, %v1936_v23  ;;  %vm1953_vm1 = vweird.f32 %v3372_v32 }
 0x41a   : > { %3373 = vrcp.f32 %v1762_v42  ;;  %v1945_v46 = vsel %vm1942_vm0, %v1944_v29, %v1940_v2  ;;  %v1973_v37 = vand.u32 2147483648, %v1762_v42  ;;  %vm1954_vm3 = vmor %vm1952_vm2, %vm1953_vm1  ;;  %vm1967_vm5 = vweird.f32 %v1762_v42 }
 0x41b   : > { %v1949_v19 = vsub.f32 1.0, %v1948_v28  ;;  %v1946_v21 = vmul.f32 %v4677_v58, %v1945_v46  ;;  %v1971_v58 = vand.u32 2147483647, %v1762_v42 }
 0x41c   : > { %v1974_v35 = vor.u32 1.1754944e-38, %v1973_v37 }
 0x41d   : > { %v2012_v49 = vpack.c.bf16 %v1946_v21, %v1931_v12  ;;  %v1950_v50 = vmul.f32 %v3372_v32, %v1949_v19  ;;  %v4738_v1 = vpop.f32.mrf.mxu0  ;;  %vm1972_vm8 = vcmp.eq.f32.partialorder %v1971_v58, 8.507059e+37 }
 0x41f   : > { %2112 = vmatmul.bf16.gmra.mxu0 %v2012_v49  ;;  %v1951_v20 = vadd.f32 %v3372_v32, %v1950_v50 }
 0x420   : > { %v3374_v48 = vpop.eup %3373 }
 0x421   : > { %v1963_v6 = vmul.f32 %v3374_v48, %v1762_v42  ;;  %v1764_v60 = vpop.xlane.xlu0 %1763  ;;  %vm1968_vm4 = vweird.f32 %v3374_v48  ;;  %v1955_v3 = vsel %vm1954_vm3, %v3372_v32, %v1951_v20  ;;  %v2148_v39 = vpop.permute.xlu2 %2147 }
 0x422   : > { %3375 = vrcp.f32 %v1764_v60  ;;  %vm1969_vm7 = vmor %vm1967_vm5, %vm1968_vm4  ;;  %v1960_v44 = vsel %vm1957_vm6, %v1959_v40, %v1955_v3  ;;  %vm2194_vm9 = vcmp.eq.s32.totalorder %v4745_v53, %v2148_v39  ;;  %v1988_v43 = vand.u32 2147483648, %v1764_v60 }
 0x423   : > { %v1964_v9 = vsub.f32 1.0, %v1963_v6  ;;  %v1961_v5 = vmul.f32 %v4684_v15, %v1960_v44  ;;  %v2210_v31 = vsel %vm2194_vm9, %v4732_v22, 0.0  ;;  %v1986_v45 = vand.u32 2147483647, %v1764_v60 }
 0x424   : > { %vm1982_vm11 = vweird.f32 %v1764_v60  ;;  %v2226_v11 = vpack.c.bf16 %v2210_v31, %v2210_v31  ;;  %v1989_v24 = vor.u32 1.1754944e-38, %v1988_v43 }
 0x425   : > { %v1965_v38 = vmul.f32 %v3374_v48, %v1964_v9  ;;  %v4740_v55 = vpop.f32.mrf.mxu0  ;;  %vm1987_vm15 = vcmp.eq.f32.partialorder %v1986_v45, 8.507059e+37 }
 0x426   : > { %v2306_v51 = vunpack.c.l.b16 %v2226_v11 }
 0x427   : > { %v1966_v27 = vadd.f32 %v3374_v48, %v1965_v38 }
 0x428   : > { %v3376_v25 = vpop.eup %3375 }
 0x429   : > { %v1978_v62 = vmul.f32 %v3376_v25, %v1764_v60  ;;  %v1766_v17 = vpop.xlane.xlu1 %1765  ;;  %v1970_v7 = vsel %vm1969_vm7, %v3374_v48, %v1966_v27  ;;  %vm1983_vm10 = vweird.f32 %v3376_v25  ;;  %v2157_v19 = vpop.permute.xlu2 %2156 }
 0x42a   : > { %3377 = vrcp.f32 %v1766_v17  ;;  %v1975_v63 = vsel %vm1972_vm8, %v1974_v35, %v1970_v7  ;;  %v2003_v15 = vand.u32 2147483648, %v1766_v17  ;;  %vm1984_vm12 = vmor %vm1982_vm11, %vm1983_vm10  ;;  %vm1997_vm0 = vweird.f32 %v1766_v17 }
 0x42b   : > { %v1979_v4 = vsub.f32 1.0, %v1978_v62  ;;  %v1976_v34 = vmul.f32 %v4694_v0, %v1975_v63  ;;  %v2001_v0 = vand.u32 2147483647, %v1766_v17  ;;  %vm2197_vm3 = vcmp.eq.s32.totalorder %v4745_v53, %v2157_v19 }
 0x42c   : > { %v2004_v32 = vor.u32 1.1754944e-38, %v2003_v15  ;;  %v2213_v50 = vsel %vm2197_vm3, %v4740_v55, 0.0 }
 0x42d   : > { %v1980_v57 = vmul.f32 %v3376_v25, %v1979_v4  ;;  %v2013_v33 = vpack.c.bf16 %v1976_v34, %v1961_v5  ;;  %v2098_v14 = vpop.f32.mrf.mxu0  ;;  %vm2002_vm2 = vcmp.eq.f32.partialorder %v2001_v0, 8.507059e+37 }
 0x42f   : > { %2117 = vmatmul.bf16.gmra.mxu0 %v2013_v33  ;;  %v1981_v13 = vadd.f32 %v3376_v25, %v1980_v57 }
 0x430   : > { %v3378_v16 = vpop.eup %3377 }
 0x431   : > { %v1993_v59 = vmul.f32 %v3378_v16, %v1766_v17  ;;  %v1985_v56 = vsel %vm1984_vm12, %v3376_v25, %v1981_v13  ;;  %vm1998_vm14 = vweird.f32 %v3378_v16 }
 0x432   : > { %v1990_v23 = vsel %vm1987_vm15, %v1989_v24, %v1985_v56  ;;  %vm1999_vm1 = vmor %vm1997_vm0, %vm1998_vm14 }
 0x433   : > { %v1994_v10 = vsub.f32 1.0, %v1993_v59  ;;  %v1991_v46 = vmul.f32 %v4701_v41, %v1990_v23  ;;  %v2229_v41 = vpack.c.bf16 %v2213_v50, %v2213_v50 }
 0x434   : > { %v2151_v26 = vpop.permute.xlu0 %2150 }
 0x435   : > { %v1995_v8 = vmul.f32 %v3378_v16, %v1994_v10  ;;  %vm2195_vm13 = vcmp.eq.s32.totalorder %v4745_v53, %v2151_v26  ;;  %v2100_v12 = vpop.f32.mrf.mxu0  ;;  %v2309_v9 = vunpack.c.l.b16 %v2229_v41 }
 0x436   : > { %v2211_v22 = vsel %vm2195_vm13, %v4734_v52, 0.0 }
 0x437   : > { %v2227_v47 = vpack.c.bf16 %v2211_v22, %v2211_v22  ;;  %v3039_v18 = vpack.c.bf16 %v2211_v22, %v2210_v31  ;;  %v1996_v61 = vadd.f32 %v3378_v16, %v1995_v8 }
 0x439   : > { %3040 = vst [vmem:[%s3873_s12] sm:$0xff] %v3039_v18   ;;  %v2307_v29 = vunpack.c.l.b16 %v2227_v47  ;;  %v2000_v28 = vsel %vm1999_vm1, %v3378_v16, %v1996_v61 }
 0x43a   : > { %v2005_v42 = vsel %vm2002_vm2, %v2004_v32, %v2000_v28 }
 0x43b   : > { %v2322_v2 = vpack.c.b16 %v2307_v29, %v2306_v51  ;;  %v2006_v52 = vmul.f32 %v4709_v30, %v2005_v42  ;;  %v2163_v30 = vpop.permute.xlu2 %2162 }
 0x43c   : > { %vm2199_vm5 = vcmp.eq.s32.totalorder %v4745_v53, %v2163_v30  ;;  %v2172_v16 = vpop.permute.xlu0 %2171 }
 0x43d   : > { %2338 = vxpose.xlu2.c.b16.start [1/8] %v2322_v2, 128  ;;  %v2014_v21 = vpack.c.bf16 %v2006_v52, %v1991_v46  ;;  %v2103_v20 = vpop.f32.mrf.mxu0  ;;  %v2215_v38 = vsel %vm2199_vm5, %v2100_v12, 0.0  ;;  %vm2202_vm9 = vcmp.eq.s32.totalorder %v4745_v53, %v2172_v16 }
 0x43e   : > { %v2231_v44 = vpack.c.bf16 %v2215_v38, %v2215_v38 }
 0x43f   : > { %2122 = vmatmul.bf16.gmra.mxu0 %v2014_v21 }
 0x440   : > { %v2311_v35 = vunpack.c.l.b16 %v2231_v44 }
 0x441   : > { %v2154_v49 = vpop.permute.xlu1 %2153 }
 0x442   : > { %vm2196_vm4 = vcmp.eq.s32.totalorder %v4745_v53, %v2154_v49 }
 0x443   : > { %v2212_v48 = vsel %vm2196_vm4, %v4738_v1, 0.0  ;;  %v2169_v1 = vpop.permute.xlu2 %2168 }
 0x444   : > { %v2228_v6 = vpack.c.bf16 %v2212_v48, %v2212_v48  ;;  %v3044_v60 = vpack.c.bf16 %v2213_v50, %v2212_v48  ;;  %vm2201_vm7 = vcmp.eq.s32.totalorder %v4745_v53, %v2169_v1  ;;  %v2181_v22 = vpop.permute.xlu0 %2180 }
 0x445   : > { %v2105_v40 = vpop.f32.mrf.mxu0  ;;  %vm2205_vm12 = vcmp.eq.s32.totalorder %v4745_v53, %v2181_v22 }
 0x446   : > { %3083 = vst [vmem:[%s3873_s12 + $0x8] sm:$0xff] %v3044_v60   ;;  %v2308_v54 = vunpack.c.l.b16 %v2228_v6  ;;  %v2217_v25 = vsel %vm2201_vm7, %v2105_v40, 0.0 }
 0x447   : > { %v2233_v63 = vpack.c.bf16 %v2217_v25, %v2217_v25 }
 0x448   : > { %v2323_v37 = vpack.c.b16 %v2309_v9, %v2308_v54 }
 0x449   : > { %v2160_v36 = vpop.permute.xlu1 %2159  ;;  %v2313_v34 = vunpack.c.l.b16 %v2233_v63 }
 0x44a   : > { %vm2198_vm6 = vcmp.eq.s32.totalorder %v4745_v53, %v2160_v36 }
 0x44b   : > { %v2214_v3 = vsel %vm2198_vm6, %v2098_v14, 0.0  ;;  %v2178_v8 = vpop.permute.xlu2 %2177 }
 0x44c   : > { %v3049_v58 = vpack.c.bf16 %v2215_v38, %v2214_v3  ;;  %v2230_v55 = vpack.c.bf16 %v2214_v3, %v2214_v3  ;;  %vm2204_vm11 = vcmp.eq.s32.totalorder %v4745_v53, %v2178_v8  ;;  %v2190_v41 = vpop.permute.xlu0 %2189 }
 0x44d   : > { %2339 = vxpose.xlu2.c.b16.cont [2/8] %v2323_v37, 128  ;;  %vm2208_vm15 = vcmp.eq.s32.totalorder %v4745_v53, %v2190_v41 }
 0x44e   : > { %3084 = vst [vmem:[%s3873_s12 + $0x10] sm:$0xff] %v3049_v58   ;;  %v2310_v7 = vunpack.c.l.b16 %v2230_v55 }
 0x450   : > { %v2324_v4 = vpack.c.b16 %v2311_v35, %v2310_v7 }
 0x451   : > { %v2166_v27 = vpop.permute.xlu1 %2165 }
 0x452   : > { %vm2200_vm8 = vcmp.eq.s32.totalorder %v4745_v53, %v2166_v27 }
 0x453   : > { %v2216_v62 = vsel %vm2200_vm8, %v2103_v20, 0.0  ;;  %v2187_v2 = vpop.permute.xlu2 %2186 }
 0x454   : > { %v3054_v17 = vpack.c.bf16 %v2217_v25, %v2216_v62  ;;  %v2232_v39 = vpack.c.bf16 %v2216_v62, %v2216_v62  ;;  %vm2207_vm14 = vcmp.eq.s32.totalorder %v4745_v53, %v2187_v2 }
 0x456   : > { %3085 = vst [vmem:[%s3873_s12 + $0x18] sm:$0xff] %v3054_v17   ;;  %v2312_v5 = vunpack.c.l.b16 %v2232_v39 }
 0x458   : > { %v2325_v57 = vpack.c.b16 %v2313_v34, %v2312_v5 }
 0x459   : > { %v2175_v59 = vpop.permute.xlu1 %2174 }
 0x45a   : > { %vm2203_vm10 = vcmp.eq.s32.totalorder %v4745_v53, %v2175_v59 }
 0x45d   : > { %2340 = vxpose.xlu2.c.b16.cont [3/8] %v2324_v4, 128 }
 0x461   : > { %v2184_v42 = vpop.permute.xlu1 %2183 }
 0x462   : > { %vm2206_vm13 = vcmp.eq.s32.totalorder %v4745_v53, %v2184_v42 }
 0x469   : > { %v2193_v30 = vpop.permute.xlu1 %2192 }
 0x46a   : > { %vm2209_vm0 = vcmp.eq.s32.totalorder %v4745_v53, %v2193_v30 }
 0x46d   : > { %2341 = vxpose.xlu2.c.b16.cont [4/8] %v2325_v57, 128 }
 0x48c   : > { %v2108_v33 = vpop.f32.mrf.mxu0 }
 0x48d   : > { %v2218_v31 = vsel %vm2202_vm9, %v2108_v33, 0.0 }
 0x48e   : > { %v2234_v13 = vpack.c.bf16 %v2218_v31, %v2218_v31 }
 0x490   : > { %v2314_v11 = vunpack.c.l.b16 %v2234_v13 }
 0x494   : > { %v2110_v43 = vpop.f32.mrf.mxu0 }
 0x495   : > { %v2219_v14 = vsel %vm2203_vm10, %v2110_v43, 0.0 }
 0x496   : > { %v2235_v45 = vpack.c.bf16 %v2219_v14, %v2219_v14  ;;  %v3059_v10 = vpack.c.bf16 %v2219_v14, %v2218_v31 }
 0x498   : > { %3086 = vst [vmem:[%s3873_s12 + $0x20] sm:$0xff] %v3059_v10   ;;  %v2315_v15 = vunpack.c.l.b16 %v2235_v45 }
 0x49a   : > { %v2326_v26 = vpack.c.b16 %v2315_v15, %v2314_v11 }
 0x49c   : > { %v2113_v0 = vpop.f32.mrf.mxu0  ;;  %2342 = vxpose.xlu2.c.b16.cont [5/8] %v2326_v26, 128 }
 0x49d   : > { %v2220_v56 = vsel %vm2204_vm11, %v2113_v0, 0.0 }
 0x49e   : > { %v2236_v24 = vpack.c.bf16 %v2220_v56, %v2220_v56 }
 0x4a0   : > { %v2316_v32 = vunpack.c.l.b16 %v2236_v24 }
 0x4a4   : > { %v2115_v47 = vpop.f32.mrf.mxu0 }
 0x4a5   : > { %v2221_v18 = vsel %vm2205_vm12, %v2115_v47, 0.0 }
 0x4a6   : > { %v2237_v61 = vpack.c.bf16 %v2221_v18, %v2221_v18  ;;  %v3064_v23 = vpack.c.bf16 %v2221_v18, %v2220_v56 }
 0x4a8   : > { %3087 = vst [vmem:[%s3873_s12 + $0x28] sm:$0xff] %v3064_v23   ;;  %v2317_v51 = vunpack.c.l.b16 %v2237_v61 }
 0x4aa   : > { %v2327_v29 = vpack.c.b16 %v2317_v51, %v2316_v32 }
 0x4ac   : > { %v2118_v28 = vpop.f32.mrf.mxu0  ;;  %2343 = vxpose.xlu2.c.b16.cont [6/8] %v2327_v29, 128 }
 0x4ad   : > { %v2222_v46 = vsel %vm2206_vm13, %v2118_v28, 0.0 }
 0x4ae   : > { %v2238_v52 = vpack.c.bf16 %v2222_v46, %v2222_v46 }
 0x4b0   : > { %v2318_v50 = vunpack.c.l.b16 %v2238_v52 }
 0x4b4   : > { %v2120_v19 = vpop.f32.mrf.mxu0 }
 0x4b5   : > { %v2223_v12 = vsel %vm2207_vm14, %v2120_v19, 0.0 }
 0x4b6   : > { %v2239_v21 = vpack.c.bf16 %v2223_v12, %v2223_v12  ;;  %v3069_v49 = vpack.c.bf16 %v2223_v12, %v2222_v46 }
 0x4b8   : > { %3088 = vst [vmem:[%s3873_s12 + $0x30] sm:$0xff] %v3069_v49   ;;  %v2319_v48 = vunpack.c.l.b16 %v2239_v21 }
 0x4ba   : > { %v2328_v6 = vpack.c.b16 %v2319_v48, %v2318_v50 }
 0x4bc   : > { %v2123_v60 = vpop.f32.mrf.mxu0  ;;  %2344 = vxpose.xlu2.c.b16.cont [7/8] %v2328_v6, 128 }
 0x4bd   : > { %v2224_v20 = vsel %vm2208_vm15, %v2123_v60, 0.0 }
 0x4be   : > { %v2240_v54 = vpack.c.bf16 %v2224_v20, %v2224_v20 }
 0x4c0   : > { %v2320_v3 = vunpack.c.l.b16 %v2240_v54 }
 0x4c4   : > { %v2125_v9 = vpop.f32.mrf.mxu0 }
 0x4c5   : > { %v2225_v36 = vsel %vm2209_vm0, %v2125_v9, 0.0 }
 0x4c6   : > { %v2241_v38 = vpack.c.bf16 %v2225_v36, %v2225_v36  ;;  %v3074_v37 = vpack.c.bf16 %v2225_v36, %v2224_v20 }
 0x4c8   : > { %3089 = vst [vmem:[%s3873_s12 + $0x38] sm:$0xff] %v3074_v37   ;;  %v2321_v58 = vunpack.c.l.b16 %v2241_v38 }
 0x4ca   : > { %v2329_v1 = vpack.c.b16 %v2321_v58, %v2320_v3 }
 0x4cc   : > { %2345 = vxpose.xlu2.c.b16.end [8/8] %v2329_v1, 128 }
 0x4fd   : > { %v2346_v40 = vpop.trf.xlu2 }
 0x4fe   : > { %v2362_v27 = vunpack.c.l.b16 %v2346_v40  ;;  %v2363_v25 = vunpack.c.h.b16 %v2346_v40 }
 0x500   : > { %v2378_v55 = vpack.c.b16 %v2362_v27, %v2362_v27  ;;  %v2379_v53 = vpack.c.b16 %v2363_v25, %v2363_v25 }
 0x502   : > { %2410 = vst [vmem:[%s3875_s5] sm:$0xf] %v2378_v55 }
 0x503   : > { %2411 = vst [vmem:[%s3875_s5 + $0x4] sm:$0xf] %v2379_v53 }
 0x50d   : > { %v2347_v62 = vpop.trf.xlu2 }
 0x50e   : > { %v2364_v17 = vunpack.c.l.b16 %v2347_v62  ;;  %v2365_v44 = vunpack.c.h.b16 %v2347_v62 }
 0x510   : > { %v2380_v7 = vpack.c.b16 %v2364_v17, %v2364_v17  ;;  %v2381_v35 = vpack.c.b16 %v2365_v44, %v2365_v44 }
 0x512   : > { %2412 = vst [vmem:[%s3875_s5 + $0x8] sm:$0xf] %v2380_v7 }
 0x513   : > { %2413 = vst [vmem:[%s3875_s5 + $0xc] sm:$0xf] %v2381_v35 }
 0x51d   : > { %v2348_v4 = vpop.trf.xlu2 }
 0x51e   : > { %v2366_v39 = vunpack.c.l.b16 %v2348_v4  ;;  %v2367_v63 = vunpack.c.h.b16 %v2348_v4 }
 0x520   : > { %v2382_v5 = vpack.c.b16 %v2366_v39, %v2366_v39  ;;  %v2383_v34 = vpack.c.b16 %v2367_v63, %v2367_v63 }
 0x522   : > { %2414 = vst [vmem:[%s3875_s5 + $0x10] sm:$0xf] %v2382_v5 }
 0x523   : > { %2415 = vst [vmem:[%s3875_s5 + $0x14] sm:$0xf] %v2383_v34 }
 0x52d   : > { %v2349_v57 = vpop.trf.xlu2 }
 0x52e   : > { %v2368_v33 = vunpack.c.l.b16 %v2349_v57  ;;  %v2369_v16 = vunpack.c.h.b16 %v2349_v57 }
 0x530   : > { %v2384_v31 = vpack.c.b16 %v2368_v33, %v2368_v33  ;;  %v2385_v59 = vpack.c.b16 %v2369_v16, %v2369_v16 }
 0x532   : > { %2416 = vst [vmem:[%s3875_s5 + $0x18] sm:$0xf] %v2384_v31 }
 0x533   : > { %2417 = vst [vmem:[%s3875_s5 + $0x1c] sm:$0xf] %v2385_v59 }
 0x53d   : > { %v2350_v13 = vpop.trf.xlu2 }
 0x53e   : > { %v2370_v43 = vunpack.c.l.b16 %v2350_v13  ;;  %v2371_v14 = vunpack.c.h.b16 %v2350_v13 }
 0x540   : > { %v2386_v45 = vpack.c.b16 %v2370_v43, %v2370_v43  ;;  %v2387_v10 = vpack.c.b16 %v2371_v14, %v2371_v14 }
 0x542   : > { %2418 = vst [vmem:[%s3875_s5 + $0x20] sm:$0xf] %v2386_v45 }
 0x543   : > { %2419 = vst [vmem:[%s3875_s5 + $0x24] sm:$0xf] %v2387_v10 }
 0x54d   : > { %v2351_v11 = vpop.trf.xlu2 }
 0x54e   : > { %v2372_v15 = vunpack.c.l.b16 %v2351_v11  ;;  %v2373_v26 = vunpack.c.h.b16 %v2351_v11 }
 0x550   : > { %v2388_v0 = vpack.c.b16 %v2372_v15, %v2372_v15  ;;  %v2389_v8 = vpack.c.b16 %v2373_v26, %v2373_v26 }
 0x552   : > { %2420 = vst [vmem:[%s3875_s5 + $0x28] sm:$0xf] %v2388_v0 }
 0x553   : > { %2421 = vst [vmem:[%s3875_s5 + $0x2c] sm:$0xf] %v2389_v8 }
 0x55d   : > { %v2352_v56 = vpop.trf.xlu2 }
 0x55e   : > { %v2374_v22 = vunpack.c.l.b16 %v2352_v56  ;;  %v2375_v24 = vunpack.c.h.b16 %v2352_v56 }
 0x560   : > { %v2390_v47 = vpack.c.b16 %v2374_v22, %v2374_v22  ;;  %v2391_v18 = vpack.c.b16 %v2375_v24, %v2375_v24 }
 0x562   : > { %2422 = vst [vmem:[%s3875_s5 + $0x30] sm:$0xf] %v2390_v47 }
 0x563   : > { %2423 = vst [vmem:[%s3875_s5 + $0x34] sm:$0xf] %v2391_v18 }
 0x56d   : > { %v2353_v61 = vpop.trf.xlu2 }
 0x56e   : > { %v2376_v23 = vunpack.c.l.b16 %v2353_v61  ;;  %v2377_v32 = vunpack.c.h.b16 %v2353_v61 }
 0x570   : > { %v2392_v51 = vpack.c.b16 %v2376_v23, %v2376_v23  ;;  %v2393_v29 = vpack.c.b16 %v2377_v32, %v2377_v32 }
 0x572   : > { %2424 = vst [vmem:[%s3875_s5 + $0x38] sm:$0xf] %v2392_v51 }
 0x573   : > { %2425 = vst [vmem:[%s3875_s5 + $0x3c] sm:$0xf] %v2393_v29 }
 0x574 PF: > { %s2431_s9 = sand.u32 1, %s3768_s23   ;;  %s2932_s18 = sshll.u32 %s3635_s19, 2 }
 0x575   : > { %s2465_s26 = sshll.u32 %s3875_s5, 4  ;;  %s5004_s30 = sld [smem:[#allocation38_spill]]  ;;  %s2466_s26 = int_to_ptr.vmem [resolvable:$true] %s2465_s26 }
 0x576   : > { %s4801_s10 = scalar_lea.sflag [#allocation12], %s2431_s9 }
 0x57b   : > { %s2464_s27 = scalar_lea.hbm %s5004_s30, %s2932_s18  ;;  %s3489_s5 = scalar_lea.hbm %s5004_s30, 128 }
 0x57c   : > { %s2467_s24 = sshll.u32 %s2464_s27, 4  ;;  %s2468_s24 = int_to_ptr.hbm [resolvable:$true] %s2467_s24 }
 0x57d   : > { %s3483_s3 = sshra.s32 %s2468_s24, 4  ;;  %s3484_s3 = int_to_ptr.hbm [resolvable:$true] %s3483_s3 }
 0x57e   : > { %s3485_s15 = scalar_lea.hbm %s3484_s3, 64  ;;  %p3490_p0 = scmp.lt.s32.totalorder %s3484_s3, %s5004_s30 }
 0x57f   : > { %p3486_p10 = scmp.ne.s32.totalorder %s3484_s3, %s3485_s15  ;;  %p3491_p1 = scmp.lt.s32.totalorder %s3489_s5, %s3485_s15 }
 0x581   : > { %p3487_p11 = pnand %p3486_p10, %p3792_p7  ;;  %p3492_p2 = por %p3491_p1, %p3490_p0 }
 0x583   : > { %p3488_p13 = pneg %p3487_p11 }
 0x585   : > { %p3493_p4 = pnand %p3492_p2, %p3488_p13 }
 0x587   : > { %3496 = shalt.err (!%p3493_p4)
}
 0x588   : > { %s3659_s1 = smov 64   ;;  %s3660_s9 = smov 128  }
 0x589   : > { %s3661_s18 = smov 4   ;;  %s2994_s29 = sshll.u32 %s3635_s19, 6 }
 0x58a   : > { %3151 = dma.vmem_to_hbm [thread:$0]  (%p3792_p7), %s2466_s26, 1024, %s2468_s24, %s4801_s10, %s3659_s1, %s3660_s9, %s3661_s18  }
 0x58b   : > { %s2449_s16 = sshll.u32 %s3873_s12, 4  ;;  %s5005_s15 = sld [smem:[#allocation37_spill]]  ;;  %s2450_s16 = int_to_ptr.vmem [resolvable:$true] %s2449_s16 }
 0x58c   : > { %s5007_s13 = sld [smem:[#allocation39_spill]]  ;;  %s5009_s6 = sand.u32 1, %s3615_s14  }
 0x58d   : > { %s2427_s30 = scalar_lea.sflag [#allocation6], %s5009_s6 }
 0x591   : > { %s5006_s11 = smov %s5005_s15  ;;  %s2448_s23 = scalar_lea.hbm %s5005_s15, %s2994_s29 }
 0x592   : > { %s2451_s5 = sshll.u32 %s2448_s23, 4  ;;  %s5008_s0 = smov %s5007_s13  ;;  %s2452_s5 = int_to_ptr.hbm [resolvable:$true] %s2451_s5 }
 0x593   : > { %s2481_s2 = scalar_lea.hbm %s5007_s13, %s2994_s29  ;;  %s3511_s21 = sshra.s32 %s2452_s5, 4  ;;  %s3512_s21 = int_to_ptr.hbm [resolvable:$true] %s3511_s21 }
 0x594   : > { %s2484_s4 = sshll.u32 %s2481_s2, 4  ;;  %s3513_s20 = scalar_lea.hbm %s3512_s21, 64  ;;  %s2485_s4 = int_to_ptr.hbm [resolvable:$true] %s2484_s4 }
 0x595   : > { %p3514_p5 = scmp.ne.s32.totalorder %s3512_s21, %s3513_s20  ;;  %s3517_s26 = scalar_lea.hbm %s5006_s11, 128 }
 0x596   : > { %p3518_p8 = scmp.lt.s32.totalorder %s3512_s21, %s5006_s11  ;;  %p3519_p9 = scmp.lt.s32.totalorder %s3517_s26, %s3513_s20 }
 0x597   : > { %p3515_p6 = pnand %p3514_p5, %p3792_p7 }
 0x598   : > { %p3520_p10 = por %p3519_p9, %p3518_p8 }
 0x599   : > { %p3516_p3 = pneg %p3515_p6 }
 0x59b   : > { %p3521_p11 = pnand %p3520_p10, %p3516_p3 }
 0x59d   : > { %3524 = shalt.err (!%p3521_p11)
}
 0x59e   : > { %3150 = dma.vmem_to_hbm [thread:$0]  (%p3792_p7), %s2450_s16, 1024, %s2452_s5, %s2427_s30, %s3659_s1, %s3659_s1, %s3661_s18  }
 0x59f   : > { %s2482_s2 = sshll.u32 %s3877_s8, 4  ;;  %s3539_s6 = sshra.s32 %s2485_s4, 4  ;;  %s2483_s2 = int_to_ptr.vmem [resolvable:$true] %s2482_s2  ;;  %s3540_s6 = int_to_ptr.hbm [resolvable:$true] %s3539_s6 }
 0x5a0   : > { %s3541_s13 = scalar_lea.hbm %s3540_s6, 64  ;;  %s3545_s29 = scalar_lea.hbm %s5008_s0, 128 }
 0x5a1   : > { %p3542_p13 = scmp.ne.s32.totalorder %s3540_s6, %s3541_s13  ;;  %p3546_p2 = scmp.lt.s32.totalorder %s3540_s6, %s5008_s0 }
 0x5a2   : > { %p3547_p4 = scmp.lt.s32.totalorder %s3545_s29, %s3541_s13 }
 0x5a3   : > { %p3543_p0 = pnand %p3542_p13, %p3792_p7 }
 0x5a4   : > { %p3548_p5 = por %p3547_p4, %p3546_p2 }
 0x5a5   : > { %p3544_p1 = pneg %p3543_p0 }
 0x5a7   : > { %p3549_p6 = pnand %p3548_p5, %p3544_p1 }
 0x5a9   : > { %3552 = shalt.err (!%p3549_p6)
}
 0x5aa   : > { %3152 = dma.vmem_to_hbm [thread:$0]  (%p3792_p7), %s2483_s2, 1024, %s2485_s4, %s4801_s10, %s3659_s1, %s3659_s1, %s3661_s18  }
 0x5ab PF: > { %s5010_s8 = sld [smem:[#allocation18_spill]]  ;;  %p3182_p3 = scmp.ge.s32.totalorder %s3647_s22, 2 }
 0x5ad   : > { %p3167_p8 = pnand %p3182_p3, %p3802_p12 }
 0x5af   : > { %p3168_p9 = pneg %p3167_p8 }
 0x5b1   : > { %s2499_s16 = sand.u32 1, %s5010_s8  }
 0x5b2   : > { %s2500_s15 = scalar_lea.sflag [#allocation6], %s2499_s16 }
 0x5b3   : > { %3602 = dma.done.wait (%p3168_p9), %s2500_s15, 1024  }
 0x5b4   : > { %3604 = vsyncadd (%p3168_p9), %s2500_s15, 4294966272  ;;  %s5012_s23 = sadd.s32 4294967294, %s3647_s22  }
 0x5b5   : > { %s2509_s7 = sand.u32 1, %s5012_s23  }
 0x5b6   : > { %s2510_s5 = scalar_lea.sflag [#allocation12], %s2509_s7 }
 0x5b7   : > { %3606 = dma.done.wait (%p3168_p9), %s2510_s5, 2048  }
 0x5b8   : > { %3608 = vsyncadd (%p3168_p9), %s2510_s5, 4294965248  ;;  %s29_s22 = sadd.s32 1, %s3647_s22   ;;  %s5013_s4 = sld [smem:[#allocation19_spill]] }
 0x5b9   : > { %p26_p7 = scmp.ge.s32.totalorder %s29_s22, 6   ;;  %s5014_s15 = sld [smem:[#allocation27_spill]] }
 0x5ba   : > { %s5015_s10 = sld [smem:[#allocation28_spill]]  ;;  %s5020_s13 = smov %s3615_s14 }
 0x5bb   : > { %s5016_s18 = sld [smem:[#allocation21_spill]]  ;;  %s5022_s16 = smov %s3627_s17 }
 0x5bc   : > { %s5017_s19 = sld [smem:[#allocation22_spill]]  ;;  %28 = sbr.rel (!%p26_p7) target bundleno = 22 (0x16), region = 188 }
 0x5bd   : > { %s5018_s20 = sld [smem:[#allocation23_spill]] }
 0x5be   : > { %s5019_s21 = sld [smem:[#allocation24_spill]]  ;;  %s5021_s14 = smov %s5013_s4 }
 0x5c0   : > { %s5023_s17 = smov %s5015_s10 }
 0x5c1   :  { %2526 = vsyncpa [#allocation5], 1 }
 0x5c2   :  { %2528 = vsyncpa [#allocation5 + $0x1], 1 }
 0x5c3   :  { %2529 = vsyncpa [#allocation8], 1 }
 0x5c4   :  { %2530 = vsyncpa [#allocation6], 1 }
 0x5c5   :  { %2532 = vsyncpa [#allocation6 + $0x1], 1 }
 0x5c6   :  { %2533 = vsyncpa [#allocation12], 1 }
 0x5c7   :  { %2535 = vsyncpa [#allocation12 + $0x1], 1 }

</bundles_post_ra>
